<compile_context>
chip_gen: v5e
topology: v5e:2x2
jax: 0.10.0
libtpu: 0.0.40
codegen_flags: <defaults>
</compile_context>

<pallas_src>
import functools

import jax
import jax.numpy as jnp
from jax.experimental import pallas as pl
from jax.experimental.pallas import tpu as pltpu

# --- model hyper-params (from model.py) ---
N_FEATURES = 75
CONV_DIM1 = CONV_DIM2 = CONV_DIM3 = 64
CONCAT_DIM = 64
PRED_DIM1 = PRED_DIM2 = PRED_DIM3 = 64
OUT_DIM = 1
BN_EPS = 1e-5

LANE = 128      # all feature / hidden / output dims are zero-padded to this
SUBLANE = 8

NUM_GCN_LAYERS = 4
NUM_FC_LAYERS = 4
NUM_LAYERS = NUM_GCN_LAYERS + NUM_FC_LAYERS


def _round_up(n, m):
    return ((n + m - 1) // m) * m


def _pad2(m, rows, cols):
    """Zero-pad a 2-D array to (rows, cols)."""
    out = jnp.zeros((rows, cols), m.dtype)
    return out.at[: m.shape[0], : m.shape[1]].set(m)


# ----------------------------------------------------------------------------
# Fused kernel: GCN stack + global_add_pool + FC stack, all resident in VMEM.
# w_ref: (8, 128, 128) effective weights (BN scales folded in, zero-padded)
# b_ref: (8, 1, 128)   effective biases  (BN shifts folded in where exact)
# ----------------------------------------------------------------------------
def net_kernel(a_ref, x_ref, pool_ref, w_ref, b_ref, out_ref):
    cdt = w_ref.dtype                       # matmul operand dtype (f32 or bf16)
    a = a_ref[...]                          # (Np, Np)
    h = x_ref[...]                          # (Np, 128)

    # ---- GCN stack:  h <- relu(A_hat @ (h @ W_l) + b_l) ----
    for l in range(NUM_GCN_LAYERS):
        xw = jnp.dot(h, w_ref[l], preferred_element_type=jnp.float32)
        z = jnp.dot(a, xw.astype(cdt), preferred_element_type=jnp.float32)
        h = jnp.maximum(z + b_ref[l], 0.0).astype(cdt)

    # ---- global_add_pool via one-hot pooling matrix ----
    g = jnp.dot(pool_ref[...], h, preferred_element_type=jnp.float32)  # (Gp,128)
    # TODO(synk): F.dropout after pooling / inside FClayer is identity in eval
    # mode and is intentionally not emitted.

    # ---- FC stack: fc1/fc2/fc3 with ReLU, fc4 plain linear ----
    for l in range(NUM_GCN_LAYERS, NUM_LAYERS - 1):
        g = jnp.maximum(
            jnp.dot(g.astype(cdt), w_ref[l], preferred_element_type=jnp.float32)
            + b_ref[l],
            0.0,
        )
    out_ref[...] = (
        jnp.dot(g.astype(cdt), w_ref[NUM_LAYERS - 1],
                preferred_element_type=jnp.float32)
        + b_ref[NUM_LAYERS - 1]
    )


# ----------------------------------------------------------------------------
# Offline parameter folding + packing.
# ----------------------------------------------------------------------------
def pack_params(params):
    """Fold eval-mode BatchNorm (y*s + t) into adjacent weights/biases and pack
    all 8 layers into one (8,128,128) weight slab and one (8,1,128) bias slab."""
    w_eff, b_eff = [], []

    # GCN layers: the previous layer's BN scale folds into this layer's weight.
    prev_s = None
    for i in range(1, NUM_GCN_LAYERS + 1):
        w = params[f"gcn_w{i}"]
        b = params[f"gcn_b{i}"].reshape(-1)
        if prev_s is not None:
            w = prev_s[:, None] * w
        # TODO(synk): a non-zero BN shift feeding a GCNConv would need an
        # A_hat row-sum correction to fold into the bias; it is exact here
        # because eval-mode fresh running stats give shift == 0.
        w_eff.append(w)
        b_eff.append(b)
        prev_s = params[f"gcn_s{i}"].reshape(-1)

    # fc1 absorbs the last GCN BN scale (global_add_pool is linear, so the
    # per-feature scale commutes with it).
    w_eff.append(prev_s[:, None] * params["fc_w1"])
    b_eff.append(params["fc_b1"].reshape(-1))
    prev_s = params["fc_s1"].reshape(-1)
    prev_t = params["fc_t1"].reshape(-1)

    # fc2 / fc3: exact fold of the preceding BN scale AND shift.
    for i in (2, 3):
        w = params[f"fc_w{i}"]
        b = params[f"fc_b{i}"].reshape(-1)
        w_eff.append(prev_s[:, None] * w)
        b_eff.append(b + prev_t @ w)
        if i == 2:
            prev_s = params["fc_s2"].reshape(-1)
            prev_t = params["fc_t2"].reshape(-1)

    # fc4: plain linear (fc3 -> relu -> dropout(identity) -> fc4).
    w_eff.append(params["fc_w4"])
    b_eff.append(params["fc_b4"].reshape(-1))

    w_all = jnp.stack([_pad2(w, LANE, LANE) for w in w_eff])        # (8,128,128)
    b_all = jnp.stack([_pad2(b[None, :], 1, LANE) for b in b_eff])  # (8,1,128)
    return w_all, b_all


# ----------------------------------------------------------------------------
# Wrapper: pad inputs, pack params, single pallas_call, slice padding off.
# ----------------------------------------------------------------------------
@functools.partial(jax.jit, static_argnames=("num_graphs", "use_bf16"))
def net_forward(a_hat, x, pool, params, num_graphs, use_bf16=False):
    num_nodes = x.shape[0]
    n_pad = _round_up(max(num_nodes, LANE), LANE)
    g_pad = _round_up(max(num_graphs, SUBLANE), SUBLANE)

    x_p = _pad2(x, n_pad, LANE)
    a_p = _pad2(a_hat, n_pad, n_pad)
    pool_p = _pad2(pool, g_pad, n_pad)
    w_all, b_all = pack_params(params)

    if use_bf16:
        # bf16 operands (f32 MXU accumulation). Recommended on v6e/v7x; on v5e
        # the win is footprint only, so default stays f32.
        a_p = a_p.astype(jnp.bfloat16)
        x_p = x_p.astype(jnp.bfloat16)
        pool_p = pool_p.astype(jnp.bfloat16)
        w_all = w_all.astype(jnp.bfloat16)

    in_bytes = sum(int(t.size) * t.dtype.itemsize
                   for t in (a_p, x_p, pool_p, w_all, b_all))
    out_bytes = g_pad * LANE * 4
    scratch_bytes = 8 * n_pad * LANE * 4          # live h / xw / z temporaries
    vmem_limit = int(min(100 << 20,
                         max(32 << 20, 2 * (in_bytes + out_bytes) + scratch_bytes)))

    flops = (NUM_GCN_LAYERS * (2 * n_pad * LANE * LANE + 2 * n_pad * n_pad * LANE)
             + 2 * g_pad * n_pad * LANE
             + NUM_FC_LAYERS * 2 * g_pad * LANE * LANE)

    out = pl.pallas_call(
        net_kernel,
        out_shape=jax.ShapeDtypeStruct((g_pad, LANE), jnp.float32),
        in_specs=[pl.BlockSpec(memory_space=pltpu.MemorySpace.VMEM)] * 5,
        out_specs=pl.BlockSpec(memory_space=pltpu.MemorySpace.VMEM),
        compiler_params=pltpu.CompilerParams(vmem_limit_bytes=vmem_limit),
        cost_estimate=pl.CostEstimate(flops=flops, transcendentals=0,
                                      bytes_accessed=in_bytes + out_bytes),
    )(a_p, x_p, pool_p, w_all, b_all)

    # Net.forward: x1.detach() / torch.cat((x1,), dim=1) are identity on values.
    # Slice away node/graph/feature padding.
    return out[:num_graphs, :OUT_DIM]


# ----------------------------------------------------------------------------
# Pure-JAX reference (unfused, unfolded) for correctness validation.
# ----------------------------------------------------------------------------
def reference_forward(a_hat, x, pool, params):
    dot = functools.partial(jnp.dot, precision=jax.lax.Precision.HIGHEST)
    h = x
    for i in range(1, NUM_GCN_LAYERS + 1):
        z = dot(a_hat, dot(h, params[f"gcn_w{i}"])) + params[f"gcn_b{i}"]
        h = jnp.maximum(z, 0.0) * params[f"gcn_s{i}"] + params[f"gcn_t{i}"]
    g = dot(pool, h)
    for i in (1, 2):
        g = (jnp.maximum(dot(g, params[f"fc_w{i}"]) + params[f"fc_b{i}"], 0.0)
             * params[f"fc_s{i}"] + params[f"fc_t{i}"])
    g = jnp.maximum(dot(g, params["fc_w3"]) + params["fc_b3"], 0.0)
    return dot(g, params["fc_w4"]) + params["fc_b4"]


# ----------------------------------------------------------------------------
# Glue: graph preprocessing + deterministic parameter init
# ----------------------------------------------------------------------------
def build_gcn_adjacency(edge_index, num_nodes):
    """A_hat = D^{-1/2}(A + I)D^{-1/2} as a dense (N, N) matrix."""
    src, dst = edge_index
    a = jnp.zeros((num_nodes, num_nodes), jnp.float32).at[src, dst].set(1.0)
    a = a + jnp.eye(num_nodes, dtype=jnp.float32)           # self loops
    deg = jnp.sum(a, axis=1)
    d_inv_sqrt = jnp.where(deg > 0, 1.0 / jnp.sqrt(deg), 0.0)
    return d_inv_sqrt[:, None] * a * d_inv_sqrt[None, :]


def build_pool_matrix(batch, num_graphs, num_nodes):
    """(G, N) one-hot rows so that pool @ H == global_add_pool(H, batch)."""
    return (batch[None, :] == jnp.arange(num_graphs)[:, None]).astype(jnp.float32)


def init_params(key):
    """Deterministic synthetic weights. BN folded form: y*scale + shift with
    scale = gamma / sqrt(running_var + eps), shift = beta - mean*scale
    (fresh-module eval stats: mean=0, var=1, gamma=1, beta=0)."""
    params = {}
    bn_scale = 1.0 / jnp.sqrt(1.0 + BN_EPS)

    def linear(key, fan_in, fan_out):
        kw, kb = jax.random.split(key)
        w = jax.random.normal(kw, (fan_in, fan_out), jnp.float32) * 0.1
        b = jax.random.normal(kb, (1, fan_out), jnp.float32) * 0.1
        return w, b

    keys = jax.random.split(key, 8)
    gcn_dims = [(N_FEATURES, CONV_DIM1), (CONV_DIM1, CONV_DIM2),
                (CONV_DIM2, CONV_DIM3), (CONV_DIM3, CONCAT_DIM)]
    for i, (fi, fo) in enumerate(gcn_dims, start=1):
        w, b = linear(keys[i - 1], fi, fo)
        params[f"gcn_w{i}"], params[f"gcn_b{i}"] = w, b
        params[f"gcn_s{i}"] = jnp.full((1, fo), bn_scale, jnp.float32)
        params[f"gcn_t{i}"] = jnp.zeros((1, fo), jnp.float32)

    fc_dims = [(CONCAT_DIM, PRED_DIM1), (PRED_DIM1, PRED_DIM2),
               (PRED_DIM2, PRED_DIM3), (PRED_DIM3, OUT_DIM)]
    for i, (fi, fo) in enumerate(fc_dims, start=1):
        w, b = linear(keys[3 + i], fi, fo)
        params[f"fc_w{i}"], params[f"fc_b{i}"] = w, b
        if i <= 2:
            params[f"fc_s{i}"] = jnp.full((1, fo), bn_scale, jnp.float32)
            params[f"fc_t{i}"] = jnp.zeros((1, fo), jnp.float32)
    return params


if __name__ == "__main__":
    key = jax.random.PRNGKey(0)
    k_x, k_p = jax.random.split(key)

    # Small synthetic batch of 2 ring graphs, 8 nodes each (16 nodes total).
    num_graphs, nodes_per_graph = 2, 8
    num_nodes = num_graphs * nodes_per_graph

    src_list, dst_list = [], []
    for g in range(num_graphs):
        base = g * nodes_per_graph
        for i in range(nodes_per_graph):
            u, v = base + i, base + (i + 1) % nodes_per_graph
            src_list += [u, v]
            dst_list += [v, u]
    edge_index = jnp.array([src_list, dst_list], dtype=jnp.int32)
    batch = jnp.repeat(jnp.arange(num_graphs, dtype=jnp.int32), nodes_per_graph)

    x = jax.random.normal(k_x, (num_nodes, N_FEATURES), jnp.float32)
    a_hat = build_gcn_adjacency(edge_index, num_nodes)
    pool = build_pool_matrix(batch, num_graphs, num_nodes)
    params = init_params(k_p)

    out = net_forward(a_hat, x, pool, params, num_graphs=num_graphs)
    out = jax.block_until_ready(out)
    assert out.shape == (num_graphs, OUT_DIM)

    ref = reference_forward(a_hat, x, pool, params)
    assert jnp.allclose(out, ref, rtol=2e-3, atol=2e-3), (out, ref)

    print("KERNEL_OK")
</pallas_src>

<mosaic_0001>
module attributes {stable_mosaic.version = 11 : i64} {
  func.func @net_kernel(%arg0: memref<128x128xf32, #tpu.memory_space<vmem>>, %arg1: memref<128x128xf32, #tpu.memory_space<vmem>>, %arg2: memref<8x128xf32, #tpu.memory_space<vmem>>, %arg3: memref<8x128x128xf32, #tpu.memory_space<vmem>>, %arg4: memref<8x1x128xf32, #tpu.memory_space<vmem>>, %arg5: memref<8x128xf32, #tpu.memory_space<vmem>>) attributes {dimension_semantics = [], scalar_prefetch = 0 : i64, scratch_operands = 0 : i64, tpu.core_type = #tpu.core_type<tc>} {
    %c0 = arith.constant 0 : index
    %c0_0 = arith.constant 0 : index
    %0 = vector.load %arg0[%c0, %c0_0] : memref<128x128xf32, #tpu.memory_space<vmem>>, vector<128x128xf32>
    %c0_1 = arith.constant 0 : index
    %c0_2 = arith.constant 0 : index
    %1 = vector.load %arg1[%c0_1, %c0_2] : memref<128x128xf32, #tpu.memory_space<vmem>>, vector<128x128xf32>
    %c0_3 = arith.constant 0 : index
    %c0_4 = arith.constant 0 : index
    %c0_5 = arith.constant 0 : index
    %2 = vector.load %arg3[%c0_3, %c0_4, %c0_5] : memref<8x128x128xf32, #tpu.memory_space<vmem>>, vector<1x128x128xf32>
    %3 = vector.shape_cast %2 : vector<1x128x128xf32> to vector<128x128xf32>
    %cst = arith.constant dense<0.000000e+00> : vector<128x128xf32>
    %4 = tpu.matmul %1, %3, %cst {dimension_numbers = #tpu.dot_dimension_numbers<[1], [0], [0], [1], [0, 0, 1, 1], [], []>} : vector<128x128xf32>, vector<128x128xf32>, vector<128x128xf32> -> vector<128x128xf32>
    %cst_6 = arith.constant dense<0.000000e+00> : vector<128x128xf32>
    %5 = tpu.matmul %0, %4, %cst_6 {dimension_numbers = #tpu.dot_dimension_numbers<[1], [0], [0], [1], [0, 0, 1, 1], [], []>} : vector<128x128xf32>, vector<128x128xf32>, vector<128x128xf32> -> vector<128x128xf32>
    %c0_7 = arith.constant 0 : index
    %c0_8 = arith.constant 0 : index
    %c0_9 = arith.constant 0 : index
    %6 = vector.load %arg4[%c0_7, %c0_8, %c0_9] : memref<8x1x128xf32, #tpu.memory_space<vmem>>, vector<1x1x128xf32>
    %7 = vector.shape_cast %6 : vector<1x1x128xf32> to vector<1x128xf32>
    %8 = vector.broadcast %7 : vector<1x128xf32> to vector<128x128xf32>
    %9 = arith.addf %5, %8 : vector<128x128xf32>
    %cst_10 = arith.constant 0.000000e+00 : f32
    %10 = vector.broadcast %cst_10 : f32 to vector<128x128xf32>
    %11 = arith.maximumf %9, %10 : vector<128x128xf32>
    %c1 = arith.constant 1 : index
    %c0_11 = arith.constant 0 : index
    %c0_12 = arith.constant 0 : index
    %12 = vector.load %arg3[%c1, %c0_11, %c0_12] : memref<8x128x128xf32, #tpu.memory_space<vmem>>, vector<1x128x128xf32>
    %13 = vector.shape_cast %12 : vector<1x128x128xf32> to vector<128x128xf32>
    %cst_13 = arith.constant dense<0.000000e+00> : vector<128x128xf32>
    %14 = tpu.matmul %11, %13, %cst_13 {dimension_numbers = #tpu.dot_dimension_numbers<[1], [0], [0], [1], [0, 0, 1, 1], [], []>} : vector<128x128xf32>, vector<128x128xf32>, vector<128x128xf32> -> vector<128x128xf32>
    %cst_14 = arith.constant dense<0.000000e+00> : vector<128x128xf32>
    %15 = tpu.matmul %0, %14, %cst_14 {dimension_numbers = #tpu.dot_dimension_numbers<[1], [0], [0], [1], [0, 0, 1, 1], [], []>} : vector<128x128xf32>, vector<128x128xf32>, vector<128x128xf32> -> vector<128x128xf32>
    %c1_15 = arith.constant 1 : index
    %c0_16 = arith.constant 0 : index
    %c0_17 = arith.constant 0 : index
    %16 = vector.load %arg4[%c1_15, %c0_16, %c0_17] : memref<8x1x128xf32, #tpu.memory_space<vmem>>, vector<1x1x128xf32>
    %17 = vector.shape_cast %16 : vector<1x1x128xf32> to vector<1x128xf32>
    %18 = vector.broadcast %17 : vector<1x128xf32> to vector<128x128xf32>
    %19 = arith.addf %15, %18 : vector<128x128xf32>
    %cst_18 = arith.constant 0.000000e+00 : f32
    %20 = vector.broadcast %cst_18 : f32 to vector<128x128xf32>
    %21 = arith.maximumf %19, %20 : vector<128x128xf32>
    %c2 = arith.constant 2 : index
    %c0_19 = arith.constant 0 : index
    %c0_20 = arith.constant 0 : index
    %22 = vector.load %arg3[%c2, %c0_19, %c0_20] : memref<8x128x128xf32, #tpu.memory_space<vmem>>, vector<1x128x128xf32>
    %23 = vector.shape_cast %22 : vector<1x128x128xf32> to vector<128x128xf32>
    %cst_21 = arith.constant dense<0.000000e+00> : vector<128x128xf32>
    %24 = tpu.matmul %21, %23, %cst_21 {dimension_numbers = #tpu.dot_dimension_numbers<[1], [0], [0], [1], [0, 0, 1, 1], [], []>} : vector<128x128xf32>, vector<128x128xf32>, vector<128x128xf32> -> vector<128x128xf32>
    %cst_22 = arith.constant dense<0.000000e+00> : vector<128x128xf32>
    %25 = tpu.matmul %0, %24, %cst_22 {dimension_numbers = #tpu.dot_dimension_numbers<[1], [0], [0], [1], [0, 0, 1, 1], [], []>} : vector<128x128xf32>, vector<128x128xf32>, vector<128x128xf32> -> vector<128x128xf32>
    %c2_23 = arith.constant 2 : index
    %c0_24 = arith.constant 0 : index
    %c0_25 = arith.constant 0 : index
    %26 = vector.load %arg4[%c2_23, %c0_24, %c0_25] : memref<8x1x128xf32, #tpu.memory_space<vmem>>, vector<1x1x128xf32>
    %27 = vector.shape_cast %26 : vector<1x1x128xf32> to vector<1x128xf32>
    %28 = vector.broadcast %27 : vector<1x128xf32> to vector<128x128xf32>
    %29 = arith.addf %25, %28 : vector<128x128xf32>
    %cst_26 = arith.constant 0.000000e+00 : f32
    %30 = vector.broadcast %cst_26 : f32 to vector<128x128xf32>
    %31 = arith.maximumf %29, %30 : vector<128x128xf32>
    %c3 = arith.constant 3 : index
    %c0_27 = arith.constant 0 : index
    %c0_28 = arith.constant 0 : index
    %32 = vector.load %arg3[%c3, %c0_27, %c0_28] : memref<8x128x128xf32, #tpu.memory_space<vmem>>, vector<1x128x128xf32>
    %33 = vector.shape_cast %32 : vector<1x128x128xf32> to vector<128x128xf32>
    %cst_29 = arith.constant dense<0.000000e+00> : vector<128x128xf32>
    %34 = tpu.matmul %31, %33, %cst_29 {dimension_numbers = #tpu.dot_dimension_numbers<[1], [0], [0], [1], [0, 0, 1, 1], [], []>} : vector<128x128xf32>, vector<128x128xf32>, vector<128x128xf32> -> vector<128x128xf32>
    %cst_30 = arith.constant dense<0.000000e+00> : vector<128x128xf32>
    %35 = tpu.matmul %0, %34, %cst_30 {dimension_numbers = #tpu.dot_dimension_numbers<[1], [0], [0], [1], [0, 0, 1, 1], [], []>} : vector<128x128xf32>, vector<128x128xf32>, vector<128x128xf32> -> vector<128x128xf32>
    %c3_31 = arith.constant 3 : index
    %c0_32 = arith.constant 0 : index
    %c0_33 = arith.constant 0 : index
    %36 = vector.load %arg4[%c3_31, %c0_32, %c0_33] : memref<8x1x128xf32, #tpu.memory_space<vmem>>, vector<1x1x128xf32>
    %37 = vector.shape_cast %36 : vector<1x1x128xf32> to vector<1x128xf32>
    %38 = vector.broadcast %37 : vector<1x128xf32> to vector<128x128xf32>
    %39 = arith.addf %35, %38 : vector<128x128xf32>
    %cst_34 = arith.constant 0.000000e+00 : f32
    %40 = vector.broadcast %cst_34 : f32 to vector<128x128xf32>
    %41 = arith.maximumf %39, %40 : vector<128x128xf32>
    %c0_35 = arith.constant 0 : index
    %c0_36 = arith.constant 0 : index
    %42 = vector.load %arg2[%c0_35, %c0_36] : memref<8x128xf32, #tpu.memory_space<vmem>>, vector<8x128xf32>
    %cst_37 = arith.constant dense<0.000000e+00> : vector<8x128xf32>
    %43 = tpu.matmul %42, %41, %cst_37 {dimension_numbers = #tpu.dot_dimension_numbers<[1], [0], [0], [1], [0, 0, 1, 1], [], []>} : vector<8x128xf32>, vector<128x128xf32>, vector<8x128xf32> -> vector<8x128xf32>
    %c4 = arith.constant 4 : index
    %c0_38 = arith.constant 0 : index
    %c0_39 = arith.constant 0 : index
    %44 = vector.load %arg3[%c4, %c0_38, %c0_39] : memref<8x128x128xf32, #tpu.memory_space<vmem>>, vector<1x128x128xf32>
    %45 = vector.shape_cast %44 : vector<1x128x128xf32> to vector<128x128xf32>
    %cst_40 = arith.constant dense<0.000000e+00> : vector<8x128xf32>
    %46 = tpu.matmul %43, %45, %cst_40 {dimension_numbers = #tpu.dot_dimension_numbers<[1], [0], [0], [1], [0, 0, 1, 1], [], []>} : vector<8x128xf32>, vector<128x128xf32>, vector<8x128xf32> -> vector<8x128xf32>
    %c4_41 = arith.constant 4 : index
    %c0_42 = arith.constant 0 : index
    %c0_43 = arith.constant 0 : index
    %47 = vector.load %arg4[%c4_41, %c0_42, %c0_43] : memref<8x1x128xf32, #tpu.memory_space<vmem>>, vector<1x1x128xf32>
    %48 = vector.shape_cast %47 : vector<1x1x128xf32> to vector<1x128xf32>
    %49 = vector.broadcast %48 : vector<1x128xf32> to vector<8x128xf32>
    %50 = arith.addf %46, %49 : vector<8x128xf32>
    %cst_44 = arith.constant 0.000000e+00 : f32
    %51 = vector.broadcast %cst_44 : f32 to vector<8x128xf32>
    %52 = arith.maximumf %50, %51 : vector<8x128xf32>
    %c5 = arith.constant 5 : index
    %c0_45 = arith.constant 0 : index
    %c0_46 = arith.constant 0 : index
    %53 = vector.load %arg3[%c5, %c0_45, %c0_46] : memref<8x128x128xf32, #tpu.memory_space<vmem>>, vector<1x128x128xf32>
    %54 = vector.shape_cast %53 : vector<1x128x128xf32> to vector<128x128xf32>
    %cst_47 = arith.constant dense<0.000000e+00> : vector<8x128xf32>
    %55 = tpu.matmul %52, %54, %cst_47 {dimension_numbers = #tpu.dot_dimension_numbers<[1], [0], [0], [1], [0, 0, 1, 1], [], []>} : vector<8x128xf32>, vector<128x128xf32>, vector<8x128xf32> -> vector<8x128xf32>
    %c5_48 = arith.constant 5 : index
    %c0_49 = arith.constant 0 : index
    %c0_50 = arith.constant 0 : index
    %56 = vector.load %arg4[%c5_48, %c0_49, %c0_50] : memref<8x1x128xf32, #tpu.memory_space<vmem>>, vector<1x1x128xf32>
    %57 = vector.shape_cast %56 : vector<1x1x128xf32> to vector<1x128xf32>
    %58 = vector.broadcast %57 : vector<1x128xf32> to vector<8x128xf32>
    %59 = arith.addf %55, %58 : vector<8x128xf32>
    %cst_51 = arith.constant 0.000000e+00 : f32
    %60 = vector.broadcast %cst_51 : f32 to vector<8x128xf32>
    %61 = arith.maximumf %59, %60 : vector<8x128xf32>
    %c6 = arith.constant 6 : index
    %c0_52 = arith.constant 0 : index
    %c0_53 = arith.constant 0 : index
    %62 = vector.load %arg3[%c6, %c0_52, %c0_53] : memref<8x128x128xf32, #tpu.memory_space<vmem>>, vector<1x128x128xf32>
    %63 = vector.shape_cast %62 : vector<1x128x128xf32> to vector<128x128xf32>
    %cst_54 = arith.constant dense<0.000000e+00> : vector<8x128xf32>
    %64 = tpu.matmul %61, %63, %cst_54 {dimension_numbers = #tpu.dot_dimension_numbers<[1], [0], [0], [1], [0, 0, 1, 1], [], []>} : vector<8x128xf32>, vector<128x128xf32>, vector<8x128xf32> -> vector<8x128xf32>
    %c6_55 = arith.constant 6 : index
    %c0_56 = arith.constant 0 : index
    %c0_57 = arith.constant 0 : index
    %65 = vector.load %arg4[%c6_55, %c0_56, %c0_57] : memref<8x1x128xf32, #tpu.memory_space<vmem>>, vector<1x1x128xf32>
    %66 = vector.shape_cast %65 : vector<1x1x128xf32> to vector<1x128xf32>
    %67 = vector.broadcast %66 : vector<1x128xf32> to vector<8x128xf32>
    %68 = arith.addf %64, %67 : vector<8x128xf32>
    %cst_58 = arith.constant 0.000000e+00 : f32
    %69 = vector.broadcast %cst_58 : f32 to vector<8x128xf32>
    %70 = arith.maximumf %68, %69 : vector<8x128xf32>
    %c7 = arith.constant 7 : index
    %c0_59 = arith.constant 0 : index
    %c0_60 = arith.constant 0 : index
    %71 = vector.load %arg3[%c7, %c0_59, %c0_60] : memref<8x128x128xf32, #tpu.memory_space<vmem>>, vector<1x128x128xf32>
    %72 = vector.shape_cast %71 : vector<1x128x128xf32> to vector<128x128xf32>
    %cst_61 = arith.constant dense<0.000000e+00> : vector<8x128xf32>
    %73 = tpu.matmul %70, %72, %cst_61 {dimension_numbers = #tpu.dot_dimension_numbers<[1], [0], [0], [1], [0, 0, 1, 1], [], []>} : vector<8x128xf32>, vector<128x128xf32>, vector<8x128xf32> -> vector<8x128xf32>
    %c7_62 = arith.constant 7 : index
    %c0_63 = arith.constant 0 : index
    %c0_64 = arith.constant 0 : index
    %74 = vector.load %arg4[%c7_62, %c0_63, %c0_64] : memref<8x1x128xf32, #tpu.memory_space<vmem>>, vector<1x1x128xf32>
    %75 = vector.shape_cast %74 : vector<1x1x128xf32> to vector<1x128xf32>
    %76 = vector.broadcast %75 : vector<1x128xf32> to vector<8x128xf32>
    %77 = arith.addf %73, %76 : vector<8x128xf32>
    %c0_65 = arith.constant 0 : index
    %c0_66 = arith.constant 0 : index
    %78 = vector.load %arg5[%c0_65, %c0_66] : memref<8x128xf32, #tpu.memory_space<vmem>>, vector<8x128xf32>
    tpu.vector_store %arg5[%c0_65, %c0_66], %77 {strides = array<i32>} : memref<8x128xf32, #tpu.memory_space<vmem>>, vector<8x128xf32>,
    return
  }
}

</mosaic_0001>

<bundles_post_ra>
// kernel: net_forward.1
= control target key start
LH: loop header
LB: loop body
LE: loop exit
PB: predicated region body
PF: predicated region fallthrough
CT: control target
= control target key end

     0   :  { %s1712_s3 = inlined_call_operand.vmem [shape: f32[8,128,128], index: 3, kind: input, shape index: {}]   ;;  %s1713_s1 = inlined_call_operand.vmem [shape: f32[128,128], index: 1, kind: input, shape index: {}]   ;;  %s1714_s4 = inlined_call_operand.vmem [shape: f32[8,1,128], index: 4, kind: input, shape index: {}]   ;;  %s1715_s0 = inlined_call_operand.vmem [shape: f32[128,128], index: 0, kind: input, shape index: {}]   ;;  %s1716_s2 = inlined_call_operand.vmem [shape: f32[8,128], index: 2, kind: input, shape index: {}]   ;;  %s1717_s5 = inlined_call_operand.vmem [shape: f32[8,128], index: 5, kind: output, shape index: {}]  }
   0x1   :  { %v67_v0 = vld [vmem:[%s1712_s3 + $0x78] sm:$0xff]  ;;  %v66_v1 = vld [vmem:[%s1712_s3 + $0x70] sm:$0xff]  ;;  %v65_v2 = vld [vmem:[%s1712_s3 + $0x68] sm:$0xff] }
   0x2   :  { %68 = vmatpush.msra.mxu0 %v67_v0  ;;  %v64_v3 = vld [vmem:[%s1712_s3 + $0x60] sm:$0xff]  ;;  %v63_v4 = vld [vmem:[%s1712_s3 + $0x58] sm:$0xff]  ;;  %v62_v5 = vld [vmem:[%s1712_s3 + $0x50] sm:$0xff] }
   0x3   :  { %v61_v6 = vld [vmem:[%s1712_s3 + $0x48] sm:$0xff]  ;;  %v60_v7 = vld [vmem:[%s1712_s3 + $0x40] sm:$0xff]  ;;  %v59_v8 = vld [vmem:[%s1712_s3 + $0x38] sm:$0xff] }
   0x4   :  { %69 = vmatpush.msra.mxu0 %v66_v1  ;;  %v58_v9 = vld [vmem:[%s1712_s3 + $0x30] sm:$0xff]  ;;  %v57_v10 = vld [vmem:[%s1712_s3 + $0x28] sm:$0xff]  ;;  %v56_v11 = vld [vmem:[%s1712_s3 + $0x20] sm:$0xff] }
   0x5   :  { %v55_v12 = vld [vmem:[%s1712_s3 + $0x18] sm:$0xff]  ;;  %v54_v13 = vld [vmem:[%s1712_s3 + $0x10] sm:$0xff]  ;;  %v53_v14 = vld [vmem:[%s1712_s3 + $0x8] sm:$0xff] }
   0x6   :  { %70 = vmatpush.msra.mxu0 %v65_v2  ;;  %v52_v15 = vld [vmem:[%s1712_s3] sm:$0xff]  ;;  %v37_v17 = vld [vmem:[%s1713_s1 + $0x8] sm:$0xff]  ;;  %v38_v18 = vld [vmem:[%s1713_s1 + $0x10] sm:$0xff] }
   0x7   :  { %v36_v16 = vld [vmem:[%s1713_s1] sm:$0xff]  ;;  %v39_v19 = vld [vmem:[%s1713_s1 + $0x18] sm:$0xff]  ;;  %v41_v21 = vld [vmem:[%s1713_s1 + $0x28] sm:$0xff] }
   0x8   :  { %71 = vmatpush.msra.mxu0 %v64_v3  ;;  %v40_v20 = vld [vmem:[%s1713_s1 + $0x20] sm:$0xff]  ;;  %v42_v22 = vld [vmem:[%s1713_s1 + $0x30] sm:$0xff]  ;;  %v43_v23 = vld [vmem:[%s1713_s1 + $0x38] sm:$0xff] }
   0x9   :  { %v44_v24 = vld [vmem:[%s1713_s1 + $0x40] sm:$0xff]  ;;  %v45_v25 = vld [vmem:[%s1713_s1 + $0x48] sm:$0xff]  ;;  %v46_v26 = vld [vmem:[%s1713_s1 + $0x50] sm:$0xff] }
   0xa   :  { %72 = vmatpush.msra.mxu0 %v63_v4  ;;  %v47_v27 = vld [vmem:[%s1713_s1 + $0x58] sm:$0xff]  ;;  %v48_v28 = vld [vmem:[%s1713_s1 + $0x60] sm:$0xff]  ;;  %v49_v29 = vld [vmem:[%s1713_s1 + $0x68] sm:$0xff] }
   0xb   :  { %v50_v30 = vld [vmem:[%s1713_s1 + $0x70] sm:$0xff]  ;;  %v51_v31 = vld [vmem:[%s1713_s1 + $0x78] sm:$0xff]  ;;  %v1175_v48 = vld [vmem:[%s1715_s0] sm:$0xff] }
   0xc   :  { %73 = vmatpush.msra.mxu0 %v62_v5  ;;  %v1181_v49 = vld [vmem:[%s1715_s0 + $0x8] sm:$0xff]  ;;  %v1187_v50 = vld [vmem:[%s1715_s0 + $0x10] sm:$0xff]  ;;  %v1193_v51 = vld [vmem:[%s1715_s0 + $0x18] sm:$0xff] }
   0xd   :  { %v1199_v52 = vld [vmem:[%s1715_s0 + $0x20] sm:$0xff]  ;;  %v1205_v53 = vld [vmem:[%s1715_s0 + $0x28] sm:$0xff]  ;;  %v1211_v54 = vld [vmem:[%s1715_s0 + $0x30] sm:$0xff] }
   0xe   :  { %74 = vmatpush.msra.mxu0 %v61_v6  ;;  %v1217_v55 = vld [vmem:[%s1715_s0 + $0x38] sm:$0xff]  ;;  %v1223_v56 = vld [vmem:[%s1715_s0 + $0x40] sm:$0xff]  ;;  %v933_v58 = vld [vmem:[%s1712_s3 + $0xf0] sm:$0xff] }
   0xf   :  { %v934_v57 = vld [vmem:[%s1712_s3 + $0xf8] sm:$0xff]  ;;  %v932_v59 = vld [vmem:[%s1712_s3 + $0xe8] sm:$0xff]  ;;  %v931_v61 = vld [vmem:[%s1712_s3 + $0xe0] sm:$0xff] }
  0x10   :  { %75 = vmatpush.msra.mxu0 %v60_v7  ;;  %235 = vmatpush.msra.mxu2 %v934_v57  ;;  %v1238_v60 = vld [vmem:[%s1715_s0 + $0x48] sm:$0xff]  ;;  %v930_v62 = vld [vmem:[%s1712_s3 + $0xd8] sm:$0xff]  ;;  %v929_v63 = vld [vmem:[%s1712_s3 + $0xd0] sm:$0xff] }
  0x11   :  { %v928_v0 = vld [vmem:[%s1712_s3 + $0xc8] sm:$0xff]  ;;  %v1256_v1 = vld [vmem:[%s1715_s0 + $0x50] sm:$0xff]  ;;  %v927_v2 = vld [vmem:[%s1712_s3 + $0xc0] sm:$0xff] }
  0x12   :  { %76 = vmatpush.msra.mxu0 %v59_v8  ;;  %236 = vmatpush.msra.mxu2 %v933_v58  ;;  %v926_v3 = vld [vmem:[%s1712_s3 + $0xb8] sm:$0xff]  ;;  %v925_v4 = vld [vmem:[%s1712_s3 + $0xb0] sm:$0xff]  ;;  %v924_v5 = vld [vmem:[%s1712_s3 + $0xa8] sm:$0xff] }
  0x13   :  { %v1274_v6 = vld [vmem:[%s1715_s0 + $0x58] sm:$0xff]  ;;  %v923_v7 = vld [vmem:[%s1712_s3 + $0xa0] sm:$0xff] }
  0x14   :  { %77 = vmatpush.msra.mxu0 %v58_v9  ;;  %237 = vmatpush.msra.mxu2 %v932_v59  ;;  %v922_v8 = vld [vmem:[%s1712_s3 + $0x98] sm:$0xff]  ;;  %v921_v9 = vld [vmem:[%s1712_s3 + $0x90] sm:$0xff] }
  0x16   :  { %78 = vmatpush.msra.mxu0 %v57_v10  ;;  %238 = vmatpush.msra.mxu2 %v931_v61  ;;  %v1289_v10 = vld [vmem:[%s1715_s0 + $0x60] sm:$0xff] }
  0x18   :  { %79 = vmatpush.msra.mxu0 %v56_v11  ;;  %239 = vmatpush.msra.mxu2 %v930_v62  ;;  %v920_v11 = vld [vmem:[%s1712_s3 + $0x88] sm:$0xff] }
  0x1a   :  { %80 = vmatpush.msra.mxu0 %v55_v12  ;;  %240 = vmatpush.msra.mxu2 %v929_v63  ;;  %v919_v12 = vld [vmem:[%s1712_s3 + $0x80] sm:$0xff] }
  0x1c   :  { %81 = vmatpush.msra.mxu0 %v54_v13  ;;  %241 = vmatpush.msra.mxu2 %v928_v0  ;;  %v1301_v13 = vld [vmem:[%s1715_s0 + $0x68] sm:$0xff] }
  0x1e   :  { %82 = vmatpush.msra.mxu0 %v53_v14  ;;  %242 = vmatpush.msra.mxu2 %v927_v2  ;;  %v1307_v14 = vld [vmem:[%s1715_s0 + $0x70] sm:$0xff] }
  0x20   :  { %83 = vmatpush.msra.mxu0 %v52_v15  ;;  %243 = vmatpush.msra.mxu2 %v926_v3  ;;  %v1313_v15 = vld [vmem:[%s1715_s0 + $0x78] sm:$0xff] }
  0x21   :  { %84 = vmatmul.f32.vlgmr.msra.gmra.mxu0 %v36_v16  ;;  %v1038_v16 = vld [vmem:[%s1714_s4] ss:$0 sm:$0xff] }
  0x22   :  { %244 = vmatpush.msra.mxu2 %v925_v4 }
  0x24   :  { %245 = vmatpush.msra.mxu2 %v924_v5 }
  0x26   :  { %246 = vmatpush.msra.mxu2 %v923_v7 }
  0x28   :  { %247 = vmatpush.msra.mxu2 %v922_v8 }
  0x29   :  { %87 = vmatmul.f32.gmra.mxu0 %v37_v17 }
  0x2a   :  { %248 = vmatpush.msra.mxu2 %v921_v9 }
  0x2c   :  { %249 = vmatpush.msra.mxu2 %v920_v11 }
  0x2e   :  { %250 = vmatpush.msra.mxu2 %v919_v12 }
  0x31   :  { %90 = vmatmul.f32.gmra.mxu0 %v38_v18 }
  0x39   :  { %93 = vmatmul.f32.gmra.mxu0 %v39_v19 }
  0x41   :  { %96 = vmatmul.f32.gmra.mxu0 %v40_v20 }
  0x49   :  { %99 = vmatmul.f32.gmra.mxu0 %v41_v21 }
  0x51   :  { %102 = vmatmul.f32.gmra.mxu0 %v42_v22 }
  0x59   :  { %105 = vmatmul.f32.gmra.mxu0 %v43_v23 }
  0x61   :  { %108 = vmatmul.f32.gmra.mxu0 %v44_v24 }
  0x69   :  { %111 = vmatmul.f32.gmra.mxu0 %v45_v25 }
  0x71   :  { %114 = vmatmul.f32.gmra.mxu0 %v46_v26 }
  0x79   :  { %117 = vmatmul.f32.gmra.mxu0 %v47_v27 }
  0x81   :  { %120 = vmatmul.f32.gmra.mxu0 %v48_v28 }
  0x89   :  { %123 = vmatmul.f32.gmra.mxu0 %v49_v29 }
  0x91   :  { %126 = vmatmul.f32.gmra.mxu0 %v50_v30 }
  0x99   :  { %129 = vmatmul.f32.gmra.mxu0 %v51_v31 }
  0x9e   :  { %v85_v32 = vpop.f32.mrf.mxu0 }
  0xa6   :  { %v88_v33 = vpop.f32.mrf.mxu0 }
  0xae   :  { %v91_v34 = vpop.f32.mrf.mxu0 }
  0xb6   :  { %v94_v35 = vpop.f32.mrf.mxu0 }
  0xbe   :  { %v97_v36 = vpop.f32.mrf.mxu0 }
  0xc6   :  { %v100_v37 = vpop.f32.mrf.mxu0 }
  0xce   :  { %v103_v38 = vpop.f32.mrf.mxu0 }
  0xd6   :  { %v106_v39 = vpop.f32.mrf.mxu0 }
  0xde   :  { %v109_v40 = vpop.f32.mrf.mxu0 }
  0xe6   :  { %v112_v41 = vpop.f32.mrf.mxu0 }
  0xee   :  { %v115_v42 = vpop.f32.mrf.mxu0 }
  0xf6   :  { %v118_v43 = vpop.f32.mrf.mxu0 }
  0xfe   :  { %v121_v44 = vpop.f32.mrf.mxu0 }
 0x106   :  { %v124_v45 = vpop.f32.mrf.mxu0 }
 0x10e   :  { %v127_v46 = vpop.f32.mrf.mxu0 }
 0x116   :  { %v130_v47 = vpop.f32.mrf.mxu0 }
 0x117   :  { %137 = vmatpush.msra.mxu1 %v130_v47 }
 0x119   :  { %138 = vmatpush.msra.mxu1 %v127_v46 }
 0x11b   :  { %139 = vmatpush.msra.mxu1 %v124_v45 }
 0x11d   :  { %140 = vmatpush.msra.mxu1 %v121_v44 }
 0x11f   :  { %141 = vmatpush.msra.mxu1 %v118_v43 }
 0x121   :  { %142 = vmatpush.msra.mxu1 %v115_v42 }
 0x123   :  { %143 = vmatpush.msra.mxu1 %v112_v41 }
 0x125   :  { %144 = vmatpush.msra.mxu1 %v109_v40 }
 0x127   :  { %145 = vmatpush.msra.mxu1 %v106_v39 }
 0x129   :  { %146 = vmatpush.msra.mxu1 %v103_v38 }
 0x12b   :  { %147 = vmatpush.msra.mxu1 %v100_v37 }
 0x12d   :  { %148 = vmatpush.msra.mxu1 %v97_v36 }
 0x12f   :  { %149 = vmatpush.msra.mxu1 %v94_v35 }
 0x131   :  { %150 = vmatpush.msra.mxu1 %v91_v34 }
 0x133   :  { %151 = vmatpush.msra.mxu1 %v88_v33 }
 0x135   :  { %152 = vmatpush.msra.mxu1 %v85_v32 }
 0x136   :  { %153 = vmatmul.f32.vlgmr.msra.gmra.mxu1 %v1175_v48 }
 0x13e   :  { %156 = vmatmul.f32.gmra.mxu1 %v1181_v49 }
 0x146   :  { %159 = vmatmul.f32.gmra.mxu1 %v1187_v50 }
 0x14e   :  { %162 = vmatmul.f32.gmra.mxu1 %v1193_v51 }
 0x156   :  { %165 = vmatmul.f32.gmra.mxu1 %v1199_v52 }
 0x15e   :  { %168 = vmatmul.f32.gmra.mxu1 %v1205_v53 }
 0x166   :  { %171 = vmatmul.f32.gmra.mxu1 %v1211_v54 }
 0x16e   :  { %174 = vmatmul.f32.gmra.mxu1 %v1217_v55 }
 0x176   :  { %177 = vmatmul.f32.gmra.mxu1 %v1223_v56 }
 0x17e   :  { %180 = vmatmul.f32.gmra.mxu1 %v1238_v60 }
 0x186   :  { %183 = vmatmul.f32.gmra.mxu1 %v1256_v1 }
 0x18e   :  { %186 = vmatmul.f32.gmra.mxu1 %v1274_v6 }
 0x196   :  { %189 = vmatmul.f32.gmra.mxu1 %v1289_v10 }
 0x19e   :  { %192 = vmatmul.f32.gmra.mxu1 %v1301_v13 }
 0x1a6   :  { %195 = vmatmul.f32.gmra.mxu1 %v1307_v14 }
 0x1ae   :  { %198 = vmatmul.f32.gmra.mxu1 %v1313_v15 }
 0x1b3   :  { %v154_v17 = vpop.f32.mrf.mxu1 }
 0x1b4   :  { %v155_v18 = vadd.f32 %v1038_v16, %v154_v17 }
 0x1b6   :  { %v202_v19 = vmax.f32 %v155_v18, 0.0 }
 0x1b8   :  { %251 = vmatmul.f32.vlgmr.msra.gmra.mxu2 %v202_v19 }
 0x1bb   :  { %v157_v20 = vpop.f32.mrf.mxu1 }
 0x1bc   :  { %v158_v21 = vadd.f32 %v1038_v16, %v157_v20 }
 0x1be   :  { %v203_v22 = vmax.f32 %v158_v21, 0.0 }
 0x1c0   :  { %254 = vmatmul.f32.gmra.mxu2 %v203_v22 }
 0x1c3   :  { %v160_v23 = vpop.f32.mrf.mxu1 }
 0x1c4   :  { %v161_v24 = vadd.f32 %v1038_v16, %v160_v23 }
 0x1c6   :  { %v204_v25 = vmax.f32 %v161_v24, 0.0 }
 0x1c8   :  { %257 = vmatmul.f32.gmra.mxu2 %v204_v25 }
 0x1cb   :  { %v163_v26 = vpop.f32.mrf.mxu1 }
 0x1cc   :  { %v164_v27 = vadd.f32 %v1038_v16, %v163_v26 }
 0x1ce   :  { %v205_v28 = vmax.f32 %v164_v27, 0.0 }
 0x1d0   :  { %260 = vmatmul.f32.gmra.mxu2 %v205_v28 }
 0x1d3   :  { %v166_v29 = vpop.f32.mrf.mxu1 }
 0x1d4   :  { %v167_v30 = vadd.f32 %v1038_v16, %v166_v29 }
 0x1d6   :  { %v206_v31 = vmax.f32 %v167_v30, 0.0 }
 0x1d8   :  { %263 = vmatmul.f32.gmra.mxu2 %v206_v31 }
 0x1db   :  { %v169_v32 = vpop.f32.mrf.mxu1 }
 0x1dc   :  { %v170_v33 = vadd.f32 %v1038_v16, %v169_v32 }
 0x1de   :  { %v207_v34 = vmax.f32 %v170_v33, 0.0 }
 0x1e0   :  { %266 = vmatmul.f32.gmra.mxu2 %v207_v34  ;;  %v950_v34 = vld [vmem:[%s1712_s3 + $0x170] sm:$0xff] }
 0x1e3   :  { %v172_v35 = vpop.f32.mrf.mxu1 }
 0x1e4   :  { %v173_v36 = vadd.f32 %v1038_v16, %v172_v35  ;;  %v949_v35 = vld [vmem:[%s1712_s3 + $0x168] sm:$0xff] }
 0x1e6   :  { %v208_v37 = vmax.f32 %v173_v36, 0.0  ;;  %v948_v36 = vld [vmem:[%s1712_s3 + $0x160] sm:$0xff] }
 0x1e8   :  { %269 = vmatmul.f32.gmra.mxu2 %v208_v37  ;;  %v947_v37 = vld [vmem:[%s1712_s3 + $0x158] sm:$0xff] }
 0x1eb   :  { %v175_v38 = vpop.f32.mrf.mxu1 }
 0x1ec   :  { %v176_v39 = vadd.f32 %v1038_v16, %v175_v38  ;;  %v946_v38 = vld [vmem:[%s1712_s3 + $0x150] sm:$0xff] }
 0x1ee   :  { %v209_v40 = vmax.f32 %v176_v39, 0.0  ;;  %v945_v39 = vld [vmem:[%s1712_s3 + $0x148] sm:$0xff] }
 0x1f0   :  { %272 = vmatmul.f32.gmra.mxu2 %v209_v40  ;;  %v944_v40 = vld [vmem:[%s1712_s3 + $0x140] sm:$0xff] }
 0x1f3   :  { %v178_v41 = vpop.f32.mrf.mxu1 }
 0x1f4   :  { %v179_v42 = vadd.f32 %v1038_v16, %v178_v41  ;;  %v943_v41 = vld [vmem:[%s1712_s3 + $0x138] sm:$0xff] }
 0x1f6   :  { %v210_v43 = vmax.f32 %v179_v42, 0.0  ;;  %v942_v42 = vld [vmem:[%s1712_s3 + $0x130] sm:$0xff] }
 0x1f8   :  { %275 = vmatmul.f32.gmra.mxu2 %v210_v43  ;;  %v941_v43 = vld [vmem:[%s1712_s3 + $0x128] sm:$0xff] }
 0x1fb   :  { %v181_v44 = vpop.f32.mrf.mxu1 }
 0x1fc   :  { %v182_v45 = vadd.f32 %v1038_v16, %v181_v44  ;;  %v940_v44 = vld [vmem:[%s1712_s3 + $0x120] sm:$0xff] }
 0x1fe   :  { %v211_v46 = vmax.f32 %v182_v45, 0.0  ;;  %v939_v45 = vld [vmem:[%s1712_s3 + $0x118] sm:$0xff] }
 0x200   :  { %278 = vmatmul.f32.gmra.mxu2 %v211_v46  ;;  %v938_v46 = vld [vmem:[%s1712_s3 + $0x110] sm:$0xff] }
 0x203   :  { %v184_v47 = vpop.f32.mrf.mxu1 }
 0x204   :  { %v185_v57 = vadd.f32 %v1038_v16, %v184_v47  ;;  %v937_v47 = vld [vmem:[%s1712_s3 + $0x108] sm:$0xff] }
 0x206   :  { %v212_v58 = vmax.f32 %v185_v57, 0.0  ;;  %v936_v57 = vld [vmem:[%s1712_s3 + $0x100] sm:$0xff] }
 0x208   :  { %281 = vmatmul.f32.gmra.mxu2 %v212_v58  ;;  %v1039_v58 = vld [vmem:[%s1714_s4 + $0x1] ss:$0 sm:$0xff] }
 0x20b   :  { %v187_v59 = vpop.f32.mrf.mxu1 }
 0x20c   :  { %v188_v61 = vadd.f32 %v1038_v16, %v187_v59 }
 0x20e   :  { %v213_v62 = vmax.f32 %v188_v61, 0.0 }
 0x210   :  { %284 = vmatmul.f32.gmra.mxu2 %v213_v62 }
 0x213   :  { %v190_v63 = vpop.f32.mrf.mxu1 }
 0x214   :  { %v191_v0 = vadd.f32 %v1038_v16, %v190_v63 }
 0x216   :  { %v214_v2 = vmax.f32 %v191_v0, 0.0 }
 0x218   :  { %287 = vmatmul.f32.gmra.mxu2 %v214_v2 }
 0x21b   :  { %v193_v3 = vpop.f32.mrf.mxu1 }
 0x21c   :  { %v194_v4 = vadd.f32 %v1038_v16, %v193_v3 }
 0x21e   :  { %v215_v5 = vmax.f32 %v194_v4, 0.0 }
 0x220   :  { %290 = vmatmul.f32.gmra.mxu2 %v215_v5 }
 0x223   :  { %v196_v7 = vpop.f32.mrf.mxu1 }
 0x224   :  { %v197_v8 = vadd.f32 %v1038_v16, %v196_v7 }
 0x226   :  { %v216_v9 = vmax.f32 %v197_v8, 0.0 }
 0x228   :  { %293 = vmatmul.f32.gmra.mxu2 %v216_v9 }
 0x22b   :  { %v199_v11 = vpop.f32.mrf.mxu1 }
 0x22c   :  { %v200_v12 = vadd.f32 %v1038_v16, %v199_v11  ;;  %v951_v16 = vld [vmem:[%s1712_s3 + $0x178] sm:$0xff] }
 0x22d   :  { %403 = vmatpush.msrb.mxu0 %v951_v16 }
 0x22e   :  { %v217_v17 = vmax.f32 %v200_v12, 0.0 }
 0x22f   :  { %404 = vmatpush.msrb.mxu0 %v950_v34 }
 0x230   :  { %296 = vmatmul.f32.gmra.mxu2 %v217_v17 }
 0x231   :  { %405 = vmatpush.msrb.mxu0 %v949_v35 }
 0x233   :  { %406 = vmatpush.msrb.mxu0 %v948_v36 }
 0x235   :  { %407 = vmatpush.msrb.mxu0 %v947_v37 }
 0x237   :  { %408 = vmatpush.msrb.mxu0 %v946_v38 }
 0x239   :  { %409 = vmatpush.msrb.mxu0 %v945_v39 }
 0x23b   :  { %v252_v18 = vpop.f32.mrf.mxu2  ;;  %410 = vmatpush.msrb.mxu0 %v944_v40 }
 0x23d   :  { %411 = vmatpush.msrb.mxu0 %v943_v41 }
 0x23f   :  { %412 = vmatpush.msrb.mxu0 %v942_v42 }
 0x241   :  { %413 = vmatpush.msrb.mxu0 %v941_v43 }
 0x243   :  { %v255_v19 = vpop.f32.mrf.mxu2  ;;  %414 = vmatpush.msrb.mxu0 %v940_v44 }
 0x245   :  { %415 = vmatpush.msrb.mxu0 %v939_v45 }
 0x247   :  { %416 = vmatpush.msrb.mxu0 %v938_v46 }
 0x249   :  { %417 = vmatpush.msrb.mxu0 %v937_v47 }
 0x24b   :  { %v258_v20 = vpop.f32.mrf.mxu2  ;;  %418 = vmatpush.msrb.mxu0 %v936_v57 }
 0x253   :  { %v261_v21 = vpop.f32.mrf.mxu2 }
 0x25b   :  { %v264_v22 = vpop.f32.mrf.mxu2 }
 0x263   :  { %v267_v23 = vpop.f32.mrf.mxu2 }
 0x26b   :  { %v270_v24 = vpop.f32.mrf.mxu2 }
 0x273   :  { %v273_v25 = vpop.f32.mrf.mxu2 }
 0x27b   :  { %v276_v26 = vpop.f32.mrf.mxu2 }
 0x283   :  { %v279_v27 = vpop.f32.mrf.mxu2 }
 0x28b   :  { %v282_v28 = vpop.f32.mrf.mxu2 }
 0x293   :  { %v285_v29 = vpop.f32.mrf.mxu2 }
 0x29b   :  { %v288_v30 = vpop.f32.mrf.mxu2 }
 0x2a3   :  { %v291_v31 = vpop.f32.mrf.mxu2 }
 0x2ab   :  { %v294_v32 = vpop.f32.mrf.mxu2 }
 0x2b3   :  { %v297_v33 = vpop.f32.mrf.mxu2 }
 0x2b4   :  { %305 = vmatpush.msra.mxu3 %v297_v33 }
 0x2b6   :  { %306 = vmatpush.msra.mxu3 %v294_v32 }
 0x2b8   :  { %307 = vmatpush.msra.mxu3 %v291_v31 }
 0x2ba   :  { %308 = vmatpush.msra.mxu3 %v288_v30 }
 0x2bc   :  { %309 = vmatpush.msra.mxu3 %v285_v29 }
 0x2be   :  { %310 = vmatpush.msra.mxu3 %v282_v28 }
 0x2c0   :  { %311 = vmatpush.msra.mxu3 %v279_v27 }
 0x2c2   :  { %312 = vmatpush.msra.mxu3 %v276_v26 }
 0x2c4   :  { %313 = vmatpush.msra.mxu3 %v273_v25 }
 0x2c6   :  { %314 = vmatpush.msra.mxu3 %v270_v24 }
 0x2c8   :  { %315 = vmatpush.msra.mxu3 %v267_v23 }
 0x2ca   :  { %316 = vmatpush.msra.mxu3 %v264_v22 }
 0x2cc   :  { %317 = vmatpush.msra.mxu3 %v261_v21 }
 0x2ce   :  { %318 = vmatpush.msra.mxu3 %v258_v20 }
 0x2d0   :  { %319 = vmatpush.msra.mxu3 %v255_v19 }
 0x2d2   :  { %320 = vmatpush.msra.mxu3 %v252_v18 }
 0x2d3   :  { %321 = vmatmul.f32.vlgmr.msra.gmra.mxu3 %v1175_v48 }
 0x2db   :  { %324 = vmatmul.f32.gmra.mxu3 %v1181_v49 }
 0x2e3   :  { %327 = vmatmul.f32.gmra.mxu3 %v1187_v50 }
 0x2eb   :  { %330 = vmatmul.f32.gmra.mxu3 %v1193_v51 }
 0x2f3   :  { %333 = vmatmul.f32.gmra.mxu3 %v1199_v52 }
 0x2fb   :  { %336 = vmatmul.f32.gmra.mxu3 %v1205_v53 }
 0x303   :  { %339 = vmatmul.f32.gmra.mxu3 %v1211_v54 }
 0x30b   :  { %342 = vmatmul.f32.gmra.mxu3 %v1217_v55 }
 0x313   :  { %345 = vmatmul.f32.gmra.mxu3 %v1223_v56 }
 0x31b   :  { %348 = vmatmul.f32.gmra.mxu3 %v1238_v60 }
 0x323   :  { %351 = vmatmul.f32.gmra.mxu3 %v1256_v1 }
 0x32b   :  { %354 = vmatmul.f32.gmra.mxu3 %v1274_v6 }
 0x333   :  { %357 = vmatmul.f32.gmra.mxu3 %v1289_v10 }
 0x33b   :  { %360 = vmatmul.f32.gmra.mxu3 %v1301_v13 }
 0x343   :  { %363 = vmatmul.f32.gmra.mxu3 %v1307_v14 }
 0x34b   :  { %366 = vmatmul.f32.gmra.mxu3 %v1313_v15 }
 0x356   :  { %v322_v59 = vpop.f32.mrf.mxu3 }
 0x357   :  { %v323_v61 = vadd.f32 %v1039_v58, %v322_v59 }
 0x359   :  { %v370_v62 = vmax.f32 %v323_v61, 0.0 }
 0x35b   :  { %419 = vmatmul.f32.vlgmr.msrb.gmra.mxu0 %v370_v62 }
 0x35e   :  { %v325_v63 = vpop.f32.mrf.mxu3 }
 0x35f   :  { %v326_v0 = vadd.f32 %v1039_v58, %v325_v63 }
 0x361   :  { %v371_v2 = vmax.f32 %v326_v0, 0.0 }
 0x363   :  { %422 = vmatmul.f32.gmra.mxu0 %v371_v2 }
 0x366   :  { %v328_v3 = vpop.f32.mrf.mxu3 }
 0x367   :  { %v329_v4 = vadd.f32 %v1039_v58, %v328_v3 }
 0x369   :  { %v372_v5 = vmax.f32 %v329_v4, 0.0 }
 0x36b   :  { %425 = vmatmul.f32.gmra.mxu0 %v372_v5 }
 0x36e   :  { %v331_v7 = vpop.f32.mrf.mxu3 }
 0x36f   :  { %v332_v8 = vadd.f32 %v1039_v58, %v331_v7 }
 0x371   :  { %v373_v9 = vmax.f32 %v332_v8, 0.0 }
 0x373   :  { %428 = vmatmul.f32.gmra.mxu0 %v373_v9 }
 0x376   :  { %v334_v11 = vpop.f32.mrf.mxu3 }
 0x377   :  { %v335_v12 = vadd.f32 %v1039_v58, %v334_v11 }
 0x379   :  { %v374_v17 = vmax.f32 %v335_v12, 0.0 }
 0x37b   :  { %431 = vmatmul.f32.gmra.mxu0 %v374_v17 }
 0x37e   :  { %v337_v18 = vpop.f32.mrf.mxu3 }
 0x37f   :  { %v338_v19 = vadd.f32 %v1039_v58, %v337_v18 }
 0x381   :  { %v375_v20 = vmax.f32 %v338_v19, 0.0 }
 0x383   :  { %434 = vmatmul.f32.gmra.mxu0 %v375_v20  ;;  %v967_v20 = vld [vmem:[%s1712_s3 + $0x1f0] sm:$0xff] }
 0x386   :  { %v340_v21 = vpop.f32.mrf.mxu3 }
 0x387   :  { %v341_v22 = vadd.f32 %v1039_v58, %v340_v21  ;;  %v966_v21 = vld [vmem:[%s1712_s3 + $0x1e8] sm:$0xff] }
 0x389   :  { %v376_v23 = vmax.f32 %v341_v22, 0.0  ;;  %v965_v22 = vld [vmem:[%s1712_s3 + $0x1e0] sm:$0xff] }
 0x38b   :  { %437 = vmatmul.f32.gmra.mxu0 %v376_v23  ;;  %v964_v23 = vld [vmem:[%s1712_s3 + $0x1d8] sm:$0xff] }
 0x38e   :  { %v343_v24 = vpop.f32.mrf.mxu3 }
 0x38f   :  { %v344_v25 = vadd.f32 %v1039_v58, %v343_v24  ;;  %v963_v24 = vld [vmem:[%s1712_s3 + $0x1d0] sm:$0xff] }
 0x391   :  { %v377_v26 = vmax.f32 %v344_v25, 0.0  ;;  %v962_v25 = vld [vmem:[%s1712_s3 + $0x1c8] sm:$0xff] }
 0x393   :  { %440 = vmatmul.f32.gmra.mxu0 %v377_v26  ;;  %v961_v26 = vld [vmem:[%s1712_s3 + $0x1c0] sm:$0xff] }
 0x396   :  { %v346_v27 = vpop.f32.mrf.mxu3 }
 0x397   :  { %v347_v28 = vadd.f32 %v1039_v58, %v346_v27  ;;  %v960_v27 = vld [vmem:[%s1712_s3 + $0x1b8] sm:$0xff] }
 0x399   :  { %v378_v29 = vmax.f32 %v347_v28, 0.0  ;;  %v959_v28 = vld [vmem:[%s1712_s3 + $0x1b0] sm:$0xff] }
 0x39b   :  { %443 = vmatmul.f32.gmra.mxu0 %v378_v29  ;;  %v958_v29 = vld [vmem:[%s1712_s3 + $0x1a8] sm:$0xff] }
 0x39e   :  { %v349_v30 = vpop.f32.mrf.mxu3 }
 0x39f   :  { %v350_v31 = vadd.f32 %v1039_v58, %v349_v30  ;;  %v957_v30 = vld [vmem:[%s1712_s3 + $0x1a0] sm:$0xff] }
 0x3a1   :  { %v379_v32 = vmax.f32 %v350_v31, 0.0  ;;  %v956_v31 = vld [vmem:[%s1712_s3 + $0x198] sm:$0xff] }
 0x3a3   :  { %446 = vmatmul.f32.gmra.mxu0 %v379_v32  ;;  %v955_v32 = vld [vmem:[%s1712_s3 + $0x190] sm:$0xff] }
 0x3a6   :  { %v352_v33 = vpop.f32.mrf.mxu3 }
 0x3a7   :  { %v353_v16 = vadd.f32 %v1039_v58, %v352_v33  ;;  %v954_v33 = vld [vmem:[%s1712_s3 + $0x188] sm:$0xff] }
 0x3a9   :  { %v380_v34 = vmax.f32 %v353_v16, 0.0  ;;  %v953_v16 = vld [vmem:[%s1712_s3 + $0x180] sm:$0xff] }
 0x3ab   :  { %449 = vmatmul.f32.gmra.mxu0 %v380_v34  ;;  %v1040_v34 = vld [vmem:[%s1714_s4 + $0x2] ss:$0 sm:$0xff] }
 0x3ae   :  { %v355_v35 = vpop.f32.mrf.mxu3 }
 0x3af   :  { %v356_v36 = vadd.f32 %v1039_v58, %v355_v35 }
 0x3b1   :  { %v381_v37 = vmax.f32 %v356_v36, 0.0 }
 0x3b3   :  { %452 = vmatmul.f32.gmra.mxu0 %v381_v37 }
 0x3b6   :  { %v358_v38 = vpop.f32.mrf.mxu3 }
 0x3b7   :  { %v359_v39 = vadd.f32 %v1039_v58, %v358_v38 }
 0x3b9   :  { %v382_v40 = vmax.f32 %v359_v39, 0.0 }
 0x3bb   :  { %455 = vmatmul.f32.gmra.mxu0 %v382_v40 }
 0x3be   :  { %v361_v41 = vpop.f32.mrf.mxu3 }
 0x3bf   :  { %v362_v42 = vadd.f32 %v1039_v58, %v361_v41 }
 0x3c1   :  { %v383_v43 = vmax.f32 %v362_v42, 0.0 }
 0x3c3   :  { %458 = vmatmul.f32.gmra.mxu0 %v383_v43 }
 0x3c6   :  { %v364_v44 = vpop.f32.mrf.mxu3 }
 0x3c7   :  { %v365_v45 = vadd.f32 %v1039_v58, %v364_v44 }
 0x3c9   :  { %v384_v46 = vmax.f32 %v365_v45, 0.0 }
 0x3cb   :  { %461 = vmatmul.f32.gmra.mxu0 %v384_v46 }
 0x3ce   :  { %v367_v47 = vpop.f32.mrf.mxu3 }
 0x3cf   :  { %v368_v57 = vadd.f32 %v1039_v58, %v367_v47  ;;  %v968_v58 = vld [vmem:[%s1712_s3 + $0x1f8] sm:$0xff] }
 0x3d0   :  { %571 = vmatpush.msrb.mxu2 %v968_v58 }
 0x3d1   :  { %v385_v59 = vmax.f32 %v368_v57, 0.0 }
 0x3d2   :  { %572 = vmatpush.msrb.mxu2 %v967_v20 }
 0x3d3   :  { %464 = vmatmul.f32.gmra.mxu0 %v385_v59 }
 0x3d4   :  { %573 = vmatpush.msrb.mxu2 %v966_v21 }
 0x3d6   :  { %574 = vmatpush.msrb.mxu2 %v965_v22 }
 0x3d8   :  { %v420_v61 = vpop.f32.mrf.mxu0  ;;  %575 = vmatpush.msrb.mxu2 %v964_v23 }
 0x3da   :  { %576 = vmatpush.msrb.mxu2 %v963_v24 }
 0x3dc   :  { %577 = vmatpush.msrb.mxu2 %v962_v25 }
 0x3de   :  { %578 = vmatpush.msrb.mxu2 %v961_v26 }
 0x3e0   :  { %v423_v62 = vpop.f32.mrf.mxu0  ;;  %579 = vmatpush.msrb.mxu2 %v960_v27 }
 0x3e2   :  { %580 = vmatpush.msrb.mxu2 %v959_v28 }
 0x3e4   :  { %581 = vmatpush.msrb.mxu2 %v958_v29 }
 0x3e6   :  { %582 = vmatpush.msrb.mxu2 %v957_v30 }
 0x3e8   :  { %v426_v63 = vpop.f32.mrf.mxu0  ;;  %583 = vmatpush.msrb.mxu2 %v956_v31 }
 0x3ea   :  { %584 = vmatpush.msrb.mxu2 %v955_v32 }
 0x3ec   :  { %585 = vmatpush.msrb.mxu2 %v954_v33 }
 0x3ee   :  { %586 = vmatpush.msrb.mxu2 %v953_v16 }
 0x3f0   :  { %v429_v0 = vpop.f32.mrf.mxu0 }
 0x3f8   :  { %v432_v2 = vpop.f32.mrf.mxu0 }
 0x400   :  { %v435_v3 = vpop.f32.mrf.mxu0 }
 0x408   :  { %v438_v4 = vpop.f32.mrf.mxu0 }
 0x410   :  { %v441_v5 = vpop.f32.mrf.mxu0 }
 0x418   :  { %v444_v7 = vpop.f32.mrf.mxu0 }
 0x420   :  { %v447_v8 = vpop.f32.mrf.mxu0 }
 0x428   :  { %v450_v9 = vpop.f32.mrf.mxu0 }
 0x430   :  { %v453_v11 = vpop.f32.mrf.mxu0 }
 0x438   :  { %v456_v12 = vpop.f32.mrf.mxu0 }
 0x440   :  { %v459_v17 = vpop.f32.mrf.mxu0 }
 0x448   :  { %v462_v18 = vpop.f32.mrf.mxu0 }
 0x450   :  { %v465_v19 = vpop.f32.mrf.mxu0 }
 0x451   :  { %473 = vmatpush.msrb.mxu1 %v465_v19 }
 0x453   :  { %474 = vmatpush.msrb.mxu1 %v462_v18 }
 0x455   :  { %475 = vmatpush.msrb.mxu1 %v459_v17 }
 0x457   :  { %476 = vmatpush.msrb.mxu1 %v456_v12 }
 0x459   :  { %477 = vmatpush.msrb.mxu1 %v453_v11 }
 0x45b   :  { %478 = vmatpush.msrb.mxu1 %v450_v9 }
 0x45d   :  { %479 = vmatpush.msrb.mxu1 %v447_v8 }
 0x45f   :  { %480 = vmatpush.msrb.mxu1 %v444_v7 }
 0x461   :  { %481 = vmatpush.msrb.mxu1 %v441_v5 }
 0x463   :  { %482 = vmatpush.msrb.mxu1 %v438_v4 }
 0x465   :  { %483 = vmatpush.msrb.mxu1 %v435_v3 }
 0x467   :  { %484 = vmatpush.msrb.mxu1 %v432_v2 }
 0x469   :  { %485 = vmatpush.msrb.mxu1 %v429_v0 }
 0x46b   :  { %486 = vmatpush.msrb.mxu1 %v426_v63 }
 0x46d   :  { %487 = vmatpush.msrb.mxu1 %v423_v62 }
 0x46f   :  { %488 = vmatpush.msrb.mxu1 %v420_v61 }
 0x470   :  { %489 = vmatmul.f32.vlgmr.msrb.gmra.mxu1 %v1175_v48 }
 0x478   :  { %492 = vmatmul.f32.gmra.mxu1 %v1181_v49 }
 0x480   :  { %495 = vmatmul.f32.gmra.mxu1 %v1187_v50 }
 0x488   :  { %498 = vmatmul.f32.gmra.mxu1 %v1193_v51 }
 0x490   :  { %501 = vmatmul.f32.gmra.mxu1 %v1199_v52 }
 0x498   :  { %504 = vmatmul.f32.gmra.mxu1 %v1205_v53 }
 0x4a0   :  { %507 = vmatmul.f32.gmra.mxu1 %v1211_v54 }
 0x4a8   :  { %510 = vmatmul.f32.gmra.mxu1 %v1217_v55 }
 0x4b0   :  { %513 = vmatmul.f32.gmra.mxu1 %v1223_v56 }
 0x4b8   :  { %516 = vmatmul.f32.gmra.mxu1 %v1238_v60 }
 0x4c0   :  { %519 = vmatmul.f32.gmra.mxu1 %v1256_v1 }
 0x4c8   :  { %522 = vmatmul.f32.gmra.mxu1 %v1274_v6 }
 0x4d0   :  { %525 = vmatmul.f32.gmra.mxu1 %v1289_v10 }
 0x4d8   :  { %528 = vmatmul.f32.gmra.mxu1 %v1301_v13 }
 0x4e0   :  { %531 = vmatmul.f32.gmra.mxu1 %v1307_v14 }
 0x4e8   :  { %534 = vmatmul.f32.gmra.mxu1 %v1313_v15 }
 0x4ed   :  { %v490_v35 = vpop.f32.mrf.mxu1 }
 0x4ee   :  { %v491_v36 = vadd.f32 %v1040_v34, %v490_v35 }
 0x4f0   :  { %v538_v37 = vmax.f32 %v491_v36, 0.0 }
 0x4f2   :  { %587 = vmatmul.f32.vlgmr.msrb.gmra.mxu2 %v538_v37 }
 0x4f5   :  { %v493_v38 = vpop.f32.mrf.mxu1 }
 0x4f6   :  { %v494_v39 = vadd.f32 %v1040_v34, %v493_v38 }
 0x4f8   :  { %v539_v40 = vmax.f32 %v494_v39, 0.0 }
 0x4fa   :  { %590 = vmatmul.f32.gmra.mxu2 %v539_v40 }
 0x4fd   :  { %v496_v41 = vpop.f32.mrf.mxu1 }
 0x4fe   :  { %v497_v42 = vadd.f32 %v1040_v34, %v496_v41 }
 0x500   :  { %v540_v43 = vmax.f32 %v497_v42, 0.0 }
 0x502   :  { %593 = vmatmul.f32.gmra.mxu2 %v540_v43 }
 0x505   :  { %v499_v44 = vpop.f32.mrf.mxu1 }
 0x506   :  { %v500_v45 = vadd.f32 %v1040_v34, %v499_v44 }
 0x508   :  { %v541_v46 = vmax.f32 %v500_v45, 0.0 }
 0x50a   :  { %596 = vmatmul.f32.gmra.mxu2 %v541_v46 }
 0x50d   :  { %v502_v47 = vpop.f32.mrf.mxu1 }
 0x50e   :  { %v503_v57 = vadd.f32 %v1040_v34, %v502_v47 }
 0x510   :  { %v542_v59 = vmax.f32 %v503_v57, 0.0 }
 0x512   :  { %599 = vmatmul.f32.gmra.mxu2 %v542_v59 }
 0x515   :  { %v505_v61 = vpop.f32.mrf.mxu1 }
 0x516   :  { %v506_v62 = vadd.f32 %v1040_v34, %v505_v61 }
 0x518   :  { %v543_v63 = vmax.f32 %v506_v62, 0.0 }
 0x51a   :  { %602 = vmatmul.f32.gmra.mxu2 %v543_v63 }
 0x51d   :  { %v508_v0 = vpop.f32.mrf.mxu1 }
 0x51e   :  { %v509_v2 = vadd.f32 %v1040_v34, %v508_v0 }
 0x520   :  { %v544_v3 = vmax.f32 %v509_v2, 0.0 }
 0x522   :  { %605 = vmatmul.f32.gmra.mxu2 %v544_v3 }
 0x525   :  { %v511_v4 = vpop.f32.mrf.mxu1 }
 0x526   :  { %v512_v5 = vadd.f32 %v1040_v34, %v511_v4  ;;  %v985_v4 = vld [vmem:[%s1712_s3 + $0x278] sm:$0xff] }
 0x527   :  { %765 = vmatpush.msra.mxu1 %v985_v4  ;;  %v1017_v4 = vld [vmem:[%s1712_s3 + $0x368] sm:$0xff] }
 0x528   :  { %v545_v7 = vmax.f32 %v512_v5, 0.0  ;;  %v984_v5 = vld [vmem:[%s1712_s3 + $0x270] sm:$0xff] }
 0x529   :  { %766 = vmatpush.msra.mxu1 %v984_v5  ;;  %v1016_v5 = vld [vmem:[%s1712_s3 + $0x360] sm:$0xff] }
 0x52a   :  { %608 = vmatmul.f32.gmra.mxu2 %v545_v7 }
 0x52d   :  { %v514_v8 = vpop.f32.mrf.mxu1 }
 0x52e   :  { %v515_v9 = vadd.f32 %v1040_v34, %v514_v8 }
 0x530   :  { %v546_v11 = vmax.f32 %v515_v9, 0.0  ;;  %v983_v9 = vld [vmem:[%s1712_s3 + $0x268] sm:$0xff] }
 0x531   :  { %767 = vmatpush.msra.mxu1 %v983_v9  ;;  %v1013_v9 = vld [vmem:[%s1712_s3 + $0x348] sm:$0xff] }
 0x532   :  { %611 = vmatmul.f32.gmra.mxu2 %v546_v11 }
 0x535   :  { %v517_v12 = vpop.f32.mrf.mxu1 }
 0x536   :  { %v518_v17 = vadd.f32 %v1040_v34, %v517_v12 }
 0x538   :  { %v547_v18 = vmax.f32 %v518_v17, 0.0  ;;  %v982_v17 = vld [vmem:[%s1712_s3 + $0x260] sm:$0xff] }
 0x539   :  { %768 = vmatpush.msra.mxu1 %v982_v17  ;;  %v1010_v17 = vld [vmem:[%s1712_s3 + $0x330] sm:$0xff] }
 0x53a   :  { %614 = vmatmul.f32.gmra.mxu2 %v547_v18 }
 0x53d   :  { %v520_v19 = vpop.f32.mrf.mxu1 }
 0x53e   :  { %v521_v58 = vadd.f32 %v1040_v34, %v520_v19 }
 0x540   :  { %v548_v20 = vmax.f32 %v521_v58, 0.0  ;;  %v981_v58 = vld [vmem:[%s1712_s3 + $0x258] sm:$0xff] }
 0x541   :  { %769 = vmatpush.msra.mxu1 %v981_v58  ;;  %v1007_v58 = vld [vmem:[%s1712_s3 + $0x318] sm:$0xff] }
 0x542   :  { %617 = vmatmul.f32.gmra.mxu2 %v548_v20 }
 0x545   :  { %v523_v21 = vpop.f32.mrf.mxu1 }
 0x546   :  { %v524_v22 = vadd.f32 %v1040_v34, %v523_v21 }
 0x548   :  { %v549_v23 = vmax.f32 %v524_v22, 0.0  ;;  %v980_v22 = vld [vmem:[%s1712_s3 + $0x250] sm:$0xff] }
 0x549   :  { %770 = vmatpush.msra.mxu1 %v980_v22  ;;  %v1005_v22 = vld [vmem:[%s1712_s3 + $0x308] sm:$0xff] }
 0x54a   :  { %620 = vmatmul.f32.gmra.mxu2 %v549_v23 }
 0x54d   :  { %v526_v24 = vpop.f32.mrf.mxu1 }
 0x54e   :  { %v527_v25 = vadd.f32 %v1040_v34, %v526_v24 }
 0x550   :  { %v550_v26 = vmax.f32 %v527_v25, 0.0  ;;  %v979_v25 = vld [vmem:[%s1712_s3 + $0x248] sm:$0xff] }
 0x551   :  { %771 = vmatpush.msra.mxu1 %v979_v25  ;;  %v1004_v25 = vld [vmem:[%s1712_s3 + $0x300] sm:$0xff] }
 0x552   :  { %623 = vmatmul.f32.gmra.mxu2 %v550_v26 }
 0x555   :  { %v529_v27 = vpop.f32.mrf.mxu1 }
 0x556   :  { %v530_v28 = vadd.f32 %v1040_v34, %v529_v27 }
 0x558   :  { %v551_v29 = vmax.f32 %v530_v28, 0.0  ;;  %v978_v28 = vld [vmem:[%s1712_s3 + $0x240] sm:$0xff] }
 0x559   :  { %772 = vmatpush.msra.mxu1 %v978_v28  ;;  %v1035_v28 = vld [vmem:[%s1712_s3 + $0x3f0] sm:$0xff] }
 0x55a   :  { %626 = vmatmul.f32.gmra.mxu2 %v551_v29 }
 0x55d   :  { %v532_v30 = vpop.f32.mrf.mxu1 }
 0x55e   :  { %v533_v31 = vadd.f32 %v1040_v34, %v532_v30 }
 0x560   :  { %v552_v32 = vmax.f32 %v533_v31, 0.0  ;;  %v977_v31 = vld [vmem:[%s1712_s3 + $0x238] sm:$0xff] }
 0x561   :  { %773 = vmatpush.msra.mxu1 %v977_v31  ;;  %v1032_v31 = vld [vmem:[%s1712_s3 + $0x3d8] sm:$0xff] }
 0x562   :  { %629 = vmatmul.f32.gmra.mxu2 %v552_v32 }
 0x565   :  { %v535_v33 = vpop.f32.mrf.mxu1 }
 0x566   :  { %v536_v16 = vadd.f32 %v1040_v34, %v535_v33 }
 0x568   :  { %v553_v35 = vmax.f32 %v536_v16, 0.0  ;;  %v976_v16 = vld [vmem:[%s1712_s3 + $0x230] sm:$0xff] }
 0x569   :  { %774 = vmatpush.msra.mxu1 %v976_v16  ;;  %v1029_v16 = vld [vmem:[%s1712_s3 + $0x3c0] sm:$0xff] }
 0x56a   :  { %632 = vmatmul.f32.gmra.mxu2 %v553_v35 }
 0x575   :  { %v588_v36 = vpop.f32.mrf.mxu2 }
 0x57d   :  { %v591_v37 = vpop.f32.mrf.mxu2 }
 0x585   :  { %v594_v38 = vpop.f32.mrf.mxu2 }
 0x58d   :  { %v597_v39 = vpop.f32.mrf.mxu2 }
 0x595   :  { %v600_v40 = vpop.f32.mrf.mxu2 }
 0x59d   :  { %v603_v41 = vpop.f32.mrf.mxu2 }
 0x5a5   :  { %v606_v42 = vpop.f32.mrf.mxu2 }
 0x5ad   :  { %v609_v43 = vpop.f32.mrf.mxu2 }
 0x5b5   :  { %v612_v44 = vpop.f32.mrf.mxu2 }
 0x5bd   :  { %v615_v45 = vpop.f32.mrf.mxu2 }
 0x5c5   :  { %v618_v46 = vpop.f32.mrf.mxu2 }
 0x5cd   :  { %v621_v47 = vpop.f32.mrf.mxu2 }
 0x5d5   :  { %v624_v57 = vpop.f32.mrf.mxu2 }
 0x5dd   :  { %v627_v59 = vpop.f32.mrf.mxu2 }
 0x5e5   :  { %v630_v61 = vpop.f32.mrf.mxu2 }
 0x5ed   :  { %v633_v62 = vpop.f32.mrf.mxu2 }
 0x5ee   :  { %641 = vmatpush.msrb.mxu3 %v633_v62  ;;  %v970_v62 = vld [vmem:[%s1712_s3 + $0x200] sm:$0xff] }
 0x5f0   :  { %642 = vmatpush.msrb.mxu3 %v630_v61 }
 0x5f2   :  { %643 = vmatpush.msrb.mxu3 %v627_v59  ;;  %v971_v59 = vld [vmem:[%s1712_s3 + $0x208] sm:$0xff] }
 0x5f4   :  { %644 = vmatpush.msrb.mxu3 %v624_v57 }
 0x5f6   :  { %645 = vmatpush.msrb.mxu3 %v621_v47 }
 0x5f8   :  { %646 = vmatpush.msrb.mxu3 %v618_v46  ;;  %v972_v46 = vld [vmem:[%s1712_s3 + $0x210] sm:$0xff] }
 0x5fa   :  { %647 = vmatpush.msrb.mxu3 %v615_v45 }
 0x5fc   :  { %648 = vmatpush.msrb.mxu3 %v612_v44 }
 0x5fe   :  { %649 = vmatpush.msrb.mxu3 %v609_v43  ;;  %v973_v43 = vld [vmem:[%s1712_s3 + $0x218] sm:$0xff] }
 0x600   :  { %650 = vmatpush.msrb.mxu3 %v606_v42 }
 0x602   :  { %651 = vmatpush.msrb.mxu3 %v603_v41 }
 0x604   :  { %652 = vmatpush.msrb.mxu3 %v600_v40  ;;  %v974_v40 = vld [vmem:[%s1712_s3 + $0x220] sm:$0xff] }
 0x606   :  { %653 = vmatpush.msrb.mxu3 %v597_v39 }
 0x608   :  { %654 = vmatpush.msrb.mxu3 %v594_v38 }
 0x60a   :  { %655 = vmatpush.msrb.mxu3 %v591_v37  ;;  %v975_v37 = vld [vmem:[%s1712_s3 + $0x228] sm:$0xff] }
 0x60b   :  { %775 = vmatpush.msra.mxu1 %v975_v37  ;;  %v1026_v37 = vld [vmem:[%s1712_s3 + $0x3a8] sm:$0xff] }
 0x60c   :  { %656 = vmatpush.msrb.mxu3 %v588_v36 }
 0x60d   :  { %657 = vmatmul.f32.vlgmr.msrb.gmra.mxu3 %v1175_v48  ;;  %776 = vmatpush.msra.mxu1 %v974_v40  ;;  %v1043_v40 = vld [vmem:[%s1714_s4 + $0x5] ss:$0 sm:$0xff] }
 0x60f   :  { %777 = vmatpush.msra.mxu1 %v973_v43 }
 0x611   :  { %778 = vmatpush.msra.mxu1 %v972_v46  ;;  %v1021_v46 = vld [vmem:[%s1712_s3 + $0x380] sm:$0xff] }
 0x613   :  { %779 = vmatpush.msra.mxu1 %v971_v59 }
 0x615   :  { %660 = vmatmul.f32.gmra.mxu3 %v1181_v49  ;;  %780 = vmatpush.msra.mxu1 %v970_v62  ;;  %v1045_v62 = vld [vmem:[%s1714_s4 + $0x7] ss:$0 sm:$0xff] }
 0x61d   :  { %663 = vmatmul.f32.gmra.mxu3 %v1187_v50 }
 0x625   :  { %666 = vmatmul.f32.gmra.mxu3 %v1193_v51 }
 0x62d   :  { %669 = vmatmul.f32.gmra.mxu3 %v1199_v52 }
 0x635   :  { %672 = vmatmul.f32.gmra.mxu3 %v1205_v53 }
 0x63d   :  { %675 = vmatmul.f32.gmra.mxu3 %v1211_v54 }
 0x645   :  { %678 = vmatmul.f32.gmra.mxu3 %v1217_v55 }
 0x64d   :  { %681 = vmatmul.f32.gmra.mxu3 %v1223_v56 }
 0x655   :  { %684 = vmatmul.f32.gmra.mxu3 %v1238_v60 }
 0x65d   :  { %687 = vmatmul.f32.gmra.mxu3 %v1256_v1 }
 0x665   :  { %690 = vmatmul.f32.gmra.mxu3 %v1274_v6 }
 0x66d   :  { %693 = vmatmul.f32.gmra.mxu3 %v1289_v10 }
 0x675   :  { %696 = vmatmul.f32.gmra.mxu3 %v1301_v13 }
 0x67d   :  { %699 = vmatmul.f32.gmra.mxu3 %v1307_v14 }
 0x685   :  { %702 = vmatmul.f32.gmra.mxu3 %v1313_v15  ;;  %v1480_v15 = vld [vmem:[%s1714_s4 + $0x3] ss:$0 sm:$0xff] }
 0x690   :  { %v1469_v48 = vpop.f32.mrf.mxu3 }
 0x691   :  { %v659_v47 = vadd.f32 %v1480_v15, %v1469_v48  ;;  %v722_v48 = vld [vmem:[%s1716_s2] sm:$0xff] }
 0x698   :  { %v1471_v49 = vpop.f32.mrf.mxu3 }
 0x699   :  { %v662_v44 = vadd.f32 %v1480_v15, %v1471_v49  ;;  %v706_v49 = vmax.f32 %v659_v47, 0.0  ;;  %v1044_v47 = vld [vmem:[%s1714_s4 + $0x6] ss:$0 sm:$0xff] }
 0x69b   :  { %v707_v61 = vmax.f32 %v662_v44, 0.0  ;;  %v1023_v44 = vld [vmem:[%s1712_s3 + $0x390] sm:$0xff] }
 0x6a0   :  { %v1473_v50 = vpop.f32.mrf.mxu3 }
 0x6a1   :  { %v665_v41 = vadd.f32 %v1480_v15, %v1473_v50  ;;  %v1002_v50 = vld [vmem:[%s1712_s3 + $0x2f8] sm:$0xff] }
 0x6a2   :  { %808 = vmatpush.msra.mxu2 %v1002_v50 }
 0x6a3   :  { %v708_v57 = vmax.f32 %v665_v41, 0.0 }
 0x6a8   :  { %v1475_v51 = vpop.f32.mrf.mxu3 }
 0x6a9   :  { %v668_v38 = vadd.f32 %v1480_v15, %v1475_v51  ;;  %v1001_v51 = vld [vmem:[%s1712_s3 + $0x2f0] sm:$0xff] }
 0x6aa   :  { %809 = vmatpush.msra.mxu2 %v1001_v51 }
 0x6ab   :  { %v709_v45 = vmax.f32 %v668_v38, 0.0  ;;  %v1025_v38 = vld [vmem:[%s1712_s3 + $0x3a0] sm:$0xff] }
 0x6b0   :  { %v670_v52 = vpop.f32.mrf.mxu3 }
 0x6b1   :  { %v671_v35 = vadd.f32 %v1480_v15, %v670_v52  ;;  %v1000_v52 = vld [vmem:[%s1712_s3 + $0x2e8] sm:$0xff] }
 0x6b2   :  { %810 = vmatpush.msra.mxu2 %v1000_v52 }
 0x6b3   :  { %v710_v42 = vmax.f32 %v671_v35, 0.0  ;;  %v1028_v35 = vld [vmem:[%s1712_s3 + $0x3b8] sm:$0xff] }
 0x6b8   :  { %v673_v53 = vpop.f32.mrf.mxu3 }
 0x6b9   :  { %v674_v32 = vadd.f32 %v1480_v15, %v673_v53  ;;  %v999_v53 = vld [vmem:[%s1712_s3 + $0x2e0] sm:$0xff] }
 0x6ba   :  { %811 = vmatpush.msra.mxu2 %v999_v53 }
 0x6bb   :  { %v711_v39 = vmax.f32 %v674_v32, 0.0  ;;  %v1031_v32 = vld [vmem:[%s1712_s3 + $0x3d0] sm:$0xff] }
 0x6c0   :  { %v676_v54 = vpop.f32.mrf.mxu3 }
 0x6c1   :  { %v677_v29 = vadd.f32 %v1480_v15, %v676_v54  ;;  %v998_v54 = vld [vmem:[%s1712_s3 + $0x2d8] sm:$0xff] }
 0x6c2   :  { %812 = vmatpush.msra.mxu2 %v998_v54 }
 0x6c3   :  { %v712_v36 = vmax.f32 %v677_v29, 0.0  ;;  %v1034_v29 = vld [vmem:[%s1712_s3 + $0x3e8] sm:$0xff] }
 0x6c8   :  { %v679_v55 = vpop.f32.mrf.mxu3 }
 0x6c9   :  { %v680_v26 = vadd.f32 %v1480_v15, %v679_v55  ;;  %v997_v55 = vld [vmem:[%s1712_s3 + $0x2d0] sm:$0xff] }
 0x6ca   :  { %813 = vmatpush.msra.mxu2 %v997_v55 }
 0x6cb   :  { %v713_v33 = vmax.f32 %v680_v26, 0.0 }
 0x6d0   :  { %v682_v56 = vpop.f32.mrf.mxu3 }
 0x6d1   :  { %v683_v23 = vadd.f32 %v1480_v15, %v682_v56  ;;  %v996_v56 = vld [vmem:[%s1712_s3 + $0x2c8] sm:$0xff] }
 0x6d2   :  { %814 = vmatpush.msra.mxu2 %v996_v56 }
 0x6d3   :  { %v714_v30 = vmax.f32 %v683_v23, 0.0 }
 0x6d8   :  { %v685_v60 = vpop.f32.mrf.mxu3 }
 0x6d9   :  { %v686_v20 = vadd.f32 %v1480_v15, %v685_v60  ;;  %v995_v60 = vld [vmem:[%s1712_s3 + $0x2c0] sm:$0xff] }
 0x6da   :  { %815 = vmatpush.msra.mxu2 %v995_v60 }
 0x6db   :  { %v715_v27 = vmax.f32 %v686_v20, 0.0  ;;  %v1042_v20 = vld [vmem:[%s1714_s4 + $0x4] ss:$0 sm:$0xff] }
 0x6e0   :  { %v688_v1 = vpop.f32.mrf.mxu3 }
 0x6e1   :  { %v689_v18 = vadd.f32 %v1480_v15, %v688_v1  ;;  %v994_v1 = vld [vmem:[%s1712_s3 + $0x2b8] sm:$0xff] }
 0x6e2   :  { %816 = vmatpush.msra.mxu2 %v994_v1 }
 0x6e3   :  { %v716_v24 = vmax.f32 %v689_v18, 0.0  ;;  %v1009_v18 = vld [vmem:[%s1712_s3 + $0x328] sm:$0xff] }
 0x6e8   :  { %v691_v6 = vpop.f32.mrf.mxu3 }
 0x6e9   :  { %v692_v11 = vadd.f32 %v1480_v15, %v691_v6  ;;  %v993_v6 = vld [vmem:[%s1712_s3 + $0x2b0] sm:$0xff] }
 0x6ea   :  { %817 = vmatpush.msra.mxu2 %v993_v6 }
 0x6eb   :  { %v717_v21 = vmax.f32 %v692_v11, 0.0  ;;  %v1012_v11 = vld [vmem:[%s1712_s3 + $0x340] sm:$0xff] }
 0x6f0   :  { %v694_v10 = vpop.f32.mrf.mxu3 }
 0x6f1   :  { %v695_v7 = vadd.f32 %v1480_v15, %v694_v10  ;;  %v992_v10 = vld [vmem:[%s1712_s3 + $0x2a8] sm:$0xff] }
 0x6f2   :  { %818 = vmatpush.msra.mxu2 %v992_v10 }
 0x6f3   :  { %v718_v19 = vmax.f32 %v695_v7, 0.0  ;;  %v1015_v7 = vld [vmem:[%s1712_s3 + $0x358] sm:$0xff] }
 0x6f8   :  { %v697_v13 = vpop.f32.mrf.mxu3 }
 0x6f9   :  { %v698_v2 = vadd.f32 %v1480_v15, %v697_v13  ;;  %v991_v13 = vld [vmem:[%s1712_s3 + $0x2a0] sm:$0xff] }
 0x6fa   :  { %819 = vmatpush.msra.mxu2 %v991_v13 }
 0x6fb   :  { %v719_v12 = vmax.f32 %v698_v2, 0.0  ;;  %v1019_v2 = vld [vmem:[%s1712_s3 + $0x378] sm:$0xff] }
 0x6fc   :  { %851 = vmatpush.msra.mxu3 %v1019_v2 }
 0x700   :  { %v700_v14 = vpop.f32.mrf.mxu3 }
 0x701   :  { %v701_v63 = vadd.f32 %v1480_v15, %v700_v14  ;;  %v990_v14 = vld [vmem:[%s1712_s3 + $0x298] sm:$0xff] }
 0x702   :  { %820 = vmatpush.msra.mxu2 %v990_v14 }
 0x703   :  { %v720_v8 = vmax.f32 %v701_v63, 0.0  ;;  %v987_v63 = vld [vmem:[%s1712_s3 + $0x280] sm:$0xff] }
 0x708   :  { %v703_v34 = vpop.f32.mrf.mxu3 }
 0x709   :  { %v704_v0 = vadd.f32 %v1480_v15, %v703_v34  ;;  %v989_v15 = vld [vmem:[%s1712_s3 + $0x290] sm:$0xff]  ;;  %v988_v34 = vld [vmem:[%s1712_s3 + $0x288] sm:$0xff] }
 0x70a   :  { %821 = vmatpush.msra.mxu2 %v989_v15 }
 0x70b   :  { %v721_v3 = vmax.f32 %v704_v0, 0.0 }
 0x70c   :  { %822 = vmatpush.msra.mxu2 %v988_v34 }
 0x70d   :  { %723 = vmatpush.msra.mxu0 %v721_v3  ;;  %v1018_v3 = vld [vmem:[%s1712_s3 + $0x370] sm:$0xff] }
 0x70e   :  { %823 = vmatpush.msra.mxu2 %v987_v63  ;;  %852 = vmatpush.msra.mxu3 %v1018_v3 }
 0x70f   :  { %724 = vmatpush.msra.mxu0 %v720_v8  ;;  %v1014_v8 = vld [vmem:[%s1712_s3 + $0x350] sm:$0xff] }
 0x710   :  { %853 = vmatpush.msra.mxu3 %v1017_v4 }
 0x711   :  { %725 = vmatpush.msra.mxu0 %v719_v12  ;;  %v1011_v12 = vld [vmem:[%s1712_s3 + $0x338] sm:$0xff] }
 0x712   :  { %854 = vmatpush.msra.mxu3 %v1016_v5 }
 0x713   :  { %726 = vmatpush.msra.mxu0 %v718_v19  ;;  %v1008_v19 = vld [vmem:[%s1712_s3 + $0x320] sm:$0xff] }
 0x714   :  { %855 = vmatpush.msra.mxu3 %v1015_v7 }
 0x715   :  { %727 = vmatpush.msra.mxu0 %v717_v21  ;;  %v1006_v21 = vld [vmem:[%s1712_s3 + $0x310] sm:$0xff] }
 0x716   :  { %856 = vmatpush.msra.mxu3 %v1014_v8 }
 0x717   :  { %728 = vmatpush.msra.mxu0 %v716_v24 }
 0x718   :  { %857 = vmatpush.msra.mxu3 %v1013_v9 }
 0x719   :  { %729 = vmatpush.msra.mxu0 %v715_v27  ;;  %v1036_v27 = vld [vmem:[%s1712_s3 + $0x3f8] sm:$0xff] }
 0x71a   :  { %858 = vmatpush.msra.mxu3 %v1012_v11 }
 0x71b   :  { %730 = vmatpush.msra.mxu0 %v714_v30  ;;  %v1033_v30 = vld [vmem:[%s1712_s3 + $0x3e0] sm:$0xff] }
 0x71c   :  { %859 = vmatpush.msra.mxu3 %v1011_v12 }
 0x71d   :  { %731 = vmatpush.msra.mxu0 %v713_v33  ;;  %v1030_v33 = vld [vmem:[%s1712_s3 + $0x3c8] sm:$0xff] }
 0x71e   :  { %860 = vmatpush.msra.mxu3 %v1010_v17 }
 0x71f   :  { %732 = vmatpush.msra.mxu0 %v712_v36  ;;  %v1027_v36 = vld [vmem:[%s1712_s3 + $0x3b0] sm:$0xff] }
 0x720   :  { %861 = vmatpush.msra.mxu3 %v1009_v18 }
 0x721   :  { %733 = vmatpush.msra.mxu0 %v711_v39  ;;  %v1024_v39 = vld [vmem:[%s1712_s3 + $0x398] sm:$0xff] }
 0x722   :  { %862 = vmatpush.msra.mxu3 %v1008_v19 }
 0x723   :  { %734 = vmatpush.msra.mxu0 %v710_v42 }
 0x724   :  { %863 = vmatpush.msra.mxu3 %v1007_v58 }
 0x725   :  { %735 = vmatpush.msra.mxu0 %v709_v45  ;;  %v1022_v45 = vld [vmem:[%s1712_s3 + $0x388] sm:$0xff] }
 0x726   :  { %864 = vmatpush.msra.mxu3 %v1006_v21 }
 0x727   :  { %736 = vmatpush.msra.mxu0 %v708_v57 }
 0x728   :  { %865 = vmatpush.msra.mxu3 %v1005_v22 }
 0x729   :  { %737 = vmatpush.msra.mxu0 %v707_v61 }
 0x72a   :  { %866 = vmatpush.msra.mxu3 %v1004_v25 }
 0x72b   :  { %738 = vmatpush.msra.mxu0 %v706_v49 }
 0x72c   :  { %739 = vmatmul.f32.vlgmr.msra.gmra.mxu0 %v722_v48 }
 0x72d   :  { %894 = vmatpush.msrb.mxu0 %v1036_v27 }
 0x72f   :  { %895 = vmatpush.msrb.mxu0 %v1035_v28 }
 0x731   :  { %896 = vmatpush.msrb.mxu0 %v1034_v29 }
 0x733   :  { %897 = vmatpush.msrb.mxu0 %v1033_v30 }
 0x735   :  { %898 = vmatpush.msrb.mxu0 %v1032_v31 }
 0x737   :  { %899 = vmatpush.msrb.mxu0 %v1031_v32 }
 0x739   :  { %900 = vmatpush.msrb.mxu0 %v1030_v33 }
 0x73b   :  { %901 = vmatpush.msrb.mxu0 %v1029_v16 }
 0x73d   :  { %902 = vmatpush.msrb.mxu0 %v1028_v35 }
 0x73f   :  { %903 = vmatpush.msrb.mxu0 %v1027_v36 }
 0x741   :  { %904 = vmatpush.msrb.mxu0 %v1026_v37 }
 0x743   :  { %905 = vmatpush.msrb.mxu0 %v1025_v38 }
 0x745   :  { %906 = vmatpush.msrb.mxu0 %v1024_v39 }
 0x747   :  { %907 = vmatpush.msrb.mxu0 %v1023_v44 }
 0x749   :  { %908 = vmatpush.msrb.mxu0 %v1022_v45 }
 0x74b   :  { %909 = vmatpush.msrb.mxu0 %v1021_v46 }
 0x7a9   :  { %v740_v0 = vpop.f32.mrf.mxu0 }
 0x7aa   :  { %781 = vmatmul.f32.vlgmr.msra.gmra.mxu1 %v740_v0 }
 0x827   :  { %v782_v23 = vpop.f32.mrf.mxu1 }
 0x828   :  { %v783_v24 = vadd.f32 %v1042_v20, %v782_v23 }
 0x82a   :  { %v785_v26 = vmax.f32 %v783_v24, 0.0 }
 0x82c   :  { %824 = vmatmul.f32.vlgmr.msra.gmra.mxu2 %v785_v26 }
 0x8af   :  { %v825_v41 = vpop.f32.mrf.mxu2 }
 0x8b0   :  { %v826_v42 = vadd.f32 %v1043_v40, %v825_v41 }
 0x8b2   :  { %v828_v43 = vmax.f32 %v826_v42, 0.0 }
 0x8b4   :  { %867 = vmatmul.f32.vlgmr.msra.gmra.mxu3 %v828_v43 }
 0x937   :  { %v868_v57 = vpop.f32.mrf.mxu3 }
 0x938   :  { %v869_v59 = vadd.f32 %v1044_v47, %v868_v57 }
 0x93a   :  { %v871_v61 = vmax.f32 %v869_v59, 0.0 }
 0x93c   :  { %910 = vmatmul.f32.vlgmr.msrb.gmra.mxu0 %v871_v61 }
 0x9b9   :  { %v911_v49 = vpop.f32.mrf.mxu0 }
 0x9ba   :  { %v912_v48 = vadd.f32 %v1045_v62, %v911_v49 }
 0x9bc   :  { %914 = vst [vmem:[%s1717_s5] sm:$0xff] %v912_v48 }

</bundles_post_ra>
